<compile_context>
chip_gen: v7x
topology: tpu7x:2x2x1
jax: 0.10.0
libtpu: 0.0.40
codegen_flags: <defaults>
</compile_context>

<pallas_src>
import numpy as np
import jax
import jax.numpy as jnp
from jax.experimental import pallas as pl
from jax.experimental.pallas import tpu as pltpu


# ----------------------------------------------------------------------------
# Config (mirrors CSDI_base.__init__)
# ----------------------------------------------------------------------------
CONFIG = {
    "model": {"is_unconditional": False},
    "diffusion": {
        "num_steps_freq": 10,
        "schedule": "quad",
        "beta_start": 1e-4,
        "beta_end_mag": 0.5,
        "beta_end_ph": 0.5,
        "channels": 32,                 # hidden channels of stand-in diffmodel
        "diffusion_embedding_dim": 128, # d_model of sinusoidal step embedding
    },
}

D_MODEL = CONFIG["diffusion"]["diffusion_embedding_dim"]
CHANNELS = CONFIG["diffusion"]["channels"]


def make_beta_alpha(config_diff):
    num_steps = config_diff["num_steps_freq"]
    if config_diff["schedule"] == "quad":
        beta_mag = np.linspace(config_diff["beta_start"] ** 0.5,
                               config_diff["beta_end_mag"] ** 0.5, num_steps) ** 2
        beta_ph = np.linspace(config_diff["beta_start"] ** 0.5,
                              config_diff["beta_end_ph"] ** 0.5, num_steps) ** 2
    else:
        beta_mag = np.linspace(config_diff["beta_start"],
                               config_diff["beta_end_mag"], num_steps)
        beta_ph = np.linspace(config_diff["beta_start"],
                              config_diff["beta_end_ph"], num_steps)
    alpha_mag = np.cumprod(1.0 - beta_mag)
    alpha_ph = np.cumprod(1.0 - beta_ph)
    return (jnp.asarray(alpha_mag, jnp.float32), jnp.asarray(alpha_ph, jnp.float32))


def make_pe_table(num_steps, d_model=D_MODEL):
    # Same formula as CSDI_base.time_embedding, precomputed ONCE for all diffusion
    # steps; per-call we just gather rows by t (no scatter-built PE in the hot path).
    position = jnp.arange(num_steps, dtype=jnp.float32)[:, None]       # (T, 1)
    div_term = 1.0 / jnp.power(
        10000.0, jnp.arange(0, d_model, 2, dtype=jnp.float32) / d_model)
    pe = jnp.zeros((num_steps, d_model), jnp.float32)
    pe = pe.at[:, 0::2].set(jnp.sin(position * div_term))
    pe = pe.at[:, 1::2].set(jnp.cos(position * div_term))
    return pe


# ----------------------------------------------------------------------------
# Parameters (deterministic synthetic init; torch-style (out, in) layout).
# ----------------------------------------------------------------------------
def init_diffmodel_params(key, channels=CHANNELS, d_model=D_MODEL):
    ks = jax.random.split(key, 10)
    p = {
        # diffusion step-embedding MLP, y = W @ x + b (features on sublanes)
        "We1": jax.random.normal(ks[0], (d_model, d_model)) * 0.05,
        "be1": jax.random.normal(ks[1], (d_model, 1)) * 0.01,
        "We2": jax.random.normal(ks[2], (d_model, d_model)) * 0.05,
        "be2": jax.random.normal(ks[3], (d_model, 1)) * 0.01,
        "Wp": jax.random.normal(ks[4], (channels, d_model)) * 0.05,
        "bp": jax.random.normal(ks[5], (channels, 1)) * 0.01,
        # 1x1 conv in-projection (2 -> C) and out-projection (C -> 1)
        "W1": jax.random.normal(ks[6], (channels, 2)) * 0.5,
        "b1": jax.random.normal(ks[7], (channels, 1)) * 0.01,
        "W2": jax.random.normal(ks[8], (channels, 1)) * 0.2,
        "b2": jax.random.normal(ks[9], (1, 1)) * 0.01,
    }
    return {k: v.astype(jnp.float32) for k, v in p.items()}


def prepare_packed_params(params_mag, params_ph,
                          d_model=D_MODEL, channels=CHANNELS):
    """Pre-stack / pre-pack parameter slabs ONCE (outside the jitted forward)."""
    def stk(name):
        return jnp.stack([params_mag[name], params_ph[name]], axis=0)

    # layer-1 weights row-concatenated so one MXU pass serves both branches
    we1cat = jnp.concatenate([params_mag["We1"], params_ph["We1"]],
                             axis=0).astype(jnp.bfloat16)              # (2D, D)
    we2 = stk("We2").astype(jnp.bfloat16)                              # (2, D, D)
    wp = stk("Wp").astype(jnp.bfloat16)                                # (2, C, D)

    def pad_d(v):
        out = jnp.zeros((d_model,), jnp.float32)
        return out.at[: v.shape[0]].set(v)

    # One (2, D, 8) slab holding every small per-branch vector / scalar:
    #   col 0: be1 (D)      col 1: be2 (D)
    #   col 2: bp  (C pad)  col 3: b1 (C pad)  col 4: W2 (C pad)
    #   col 5: W1[:,0] (C pad, cond weight)    col 6: W1[:,1] (C pad, noisy weight)
    #   col 7: b2 broadcast to D rows
    smalls = []
    for p in (params_mag, params_ph):
        cols = [
            p["be1"][:, 0],
            p["be2"][:, 0],
            pad_d(p["bp"][:, 0]),
            pad_d(p["b1"][:, 0]),
            pad_d(p["W2"][:, 0]),
            pad_d(p["W1"][:, 0]),
            pad_d(p["W1"][:, 1]),
            jnp.full((d_model,), p["b2"][0, 0], jnp.float32),
        ]
        smalls.append(jnp.stack(cols, axis=1))                         # (D, 8)
    smalls = jnp.stack(smalls, axis=0).astype(jnp.float32)             # (2, D, 8)

    return {"we1cat": we1cat, "we2": we2, "wp": wp, "smalls": smalls}


# ----------------------------------------------------------------------------
# Fused kernel: step-embedding MLP (both branches, merged layer-1, bf16 MXU) +
# forward noising + stand-in diffmodel + squared-residual per-lane partials.
# Grid: one step per pixel (lane) tile; parameters stay resident across tiles.
# ----------------------------------------------------------------------------
def _csdi_fused_kernel(
    pe_ref,                       # (D, B)     bf16  transposed sinusoidal emb
    we1_ref,                      # (2D, D)    bf16  row-concat [We1_mag; We1_ph]
    we2_ref,                      # (2, D, D)  bf16
    wp_ref,                       # (2, C, D)  bf16
    sm_ref,                       # (2, D, 8)  f32   packed small vectors (see prepare)
    sab_ref,                      # (2, B, 2)  f32   [...,0]=sqrt(a) [...,1]=sqrt(1-a)
    cond_ref, tgt_ref, nz_ref,    # (2, B, TP) f32 each (one pixel tile)
    out_ref,                      # (1, TP)    f32   per-lane partial residual sums
):
    C = wp_ref.shape[1]
    D = we2_ref.shape[1]
    B = cond_ref.shape[1]

    pe = pe_ref[...]                                                   # (D, B) bf16

    # ---- layer 1 of BOTH branch MLPs in a single MXU pass (shared RHS) ----
    h1 = jnp.dot(we1_ref[...], pe,
                 preferred_element_type=jnp.float32)                   # (2D, B) f32

    partials = []
    for br in range(2):                      # branch 0 = mag, 1 = ph (static)
        sm = sm_ref[br]                                                # (D, 8)
        be1 = sm[:, 0:1]
        be2 = sm[:, 1:2]
        bp = sm[0:C, 2:3]
        b1 = sm[0:C, 3:4]
        w2 = sm[0:C, 4:5]
        w1c = sm[0:C, 5:6]
        w1n = sm[0:C, 6:7]
        b2 = sm[0:1, 7:8]

        # ---- remaining step-embedding MLP layers (bf16 MXU, f32 VPU) ----
        h = h1[br * D:(br + 1) * D, :] + be1                           # (D, B)
        h = h * jax.nn.sigmoid(h)                                      # SiLU
        h = jnp.dot(we2_ref[br], h.astype(jnp.bfloat16),
                    preferred_element_type=jnp.float32) + be2          # (D, B)
        h = h * jax.nn.sigmoid(h)
        emb = jnp.dot(wp_ref[br], h.astype(jnp.bfloat16),
                      preferred_element_type=jnp.float32) + bp         # (C, B)

        cond = cond_ref[br]                                            # (B, TP)
        tgt = tgt_ref[br]
        nz = nz_ref[br]
        sab = sab_ref[br]                                              # (B, 2)

        # forward diffusion (noising), whole batch at once (f32 VPU)
        noisy = sab[:, 0:1] * tgt + sab[:, 1:2] * nz                   # (B, TP)

        # per-batch step-embedding bias (only this tiny (C,1) assembly is per-b)
        bias = jnp.stack([emb[:, b:b + 1] + b1 for b in range(B)],
                         axis=0)                                       # (B, C, 1)

        # stand-in diffmodel, fully vectorized over batch: (B, C, TP)
        hid = (w1c[None, :, :] * cond[:, None, :]
               + w1n[None, :, :] * noisy[:, None, :]
               + bias)                                                 # (B, C, TP)
        hid = jnp.maximum(hid, 0.0)
        # 1x1 out-projection C -> 1 as VPU multiply + sublane (XLU) reduce
        pred = jnp.sum(hid * w2[None, :, :], axis=1) + b2              # (B, TP)

        partials.append(
            jnp.sum((nz - pred) ** 2, axis=0, keepdims=True))          # (1, TP)

    # two independent branch partials, summed once (no long serial acc chain)
    out_ref[...] = partials[0] + partials[1]


def _resident_spec(shape):
    n = len(shape)
    return pl.BlockSpec(shape, lambda i, _n=n: (0,) * _n)


# ----------------------------------------------------------------------------
# CSDI_base.forward  (is_train=1 training-loss path)
# ----------------------------------------------------------------------------
def process_data(batch):
    # TODO(synk): process_data is not defined in the reference source; treat it
    # as a pass-through unpack of the batch dict.
    return (batch["bs_kge"], batch["observed_data"],
            batch["target_data"], batch["target_traf"])


@jax.jit
def csdi_base_forward(batch, packed, alpha_mag, alpha_ph, pe_table,
                      t, noise_mag, noise_ph):
    # t, noise_mag, noise_ph replace torch.randint / torch.randn (passed in so
    # the reference check can use identical randoms).
    bs_kge, observed_data, target_data, target_traf = process_data(batch)
    # TODO(synk): bs_kge / target_traf are consumed only by diff_CSDI_freq,
    # whose source is not provided; the stand-in diffusion network ignores them.
    B, _, H, W = observed_data.shape
    P = H * W

    # gather precomputed sinusoidal step embedding rows; features on sublanes
    pe_t = pe_table[t].T.astype(jnp.bfloat16)                          # (D, B)

    # sqrt(alpha_t), sqrt(1-alpha_t) packed into one tiny operand (f32)
    ca = jnp.stack([alpha_mag[t], alpha_ph[t]], axis=0)                # (2, B)
    sab = jnp.stack([jnp.sqrt(ca), jnp.sqrt(1.0 - ca)],
                    axis=-1).astype(jnp.float32)                       # (2, B, 2)

    # pixels flattened onto the lane axis; branch (mag/ph) leading
    cond = jnp.transpose(observed_data, (1, 0, 2, 3)).reshape(2, B, P)
    tgt = jnp.transpose(target_data, (1, 0, 2, 3)).reshape(2, B, P)
    nz = jnp.stack([noise_mag.reshape(B, P), noise_ph.reshape(B, P)], axis=0)
    cond = cond.astype(jnp.float32)
    tgt = tgt.astype(jnp.float32)
    nz = nz.astype(jnp.float32)

    # pixel (lane) tiling: multiples of 128; larger tiles once P grows
    lane_pad = -(-P // 128) * 128
    tile_p = min(512, lane_pad)
    p_pad = -(-P // tile_p) * tile_p
    if p_pad != P:
        padw = ((0, 0), (0, 0), (0, p_pad - P))
        cond = jnp.pad(cond, padw)
        tgt = jnp.pad(tgt, padw)
        nz = jnp.pad(nz, padw)
    grid = (p_pad // tile_p,)

    resident = [pe_t, packed["we1cat"], packed["we2"], packed["wp"],
                packed["smalls"], sab]
    in_specs = [_resident_spec(a.shape) for a in resident]
    tile_spec = pl.BlockSpec((2, B, tile_p), lambda i: (0, 0, i))
    in_specs += [tile_spec, tile_spec, tile_spec]

    partial = pl.pallas_call(
        _csdi_fused_kernel,
        out_shape=jax.ShapeDtypeStruct((1, p_pad), jnp.float32),
        grid=grid,
        in_specs=in_specs,
        out_specs=pl.BlockSpec((1, tile_p), lambda i: (0, i)),
        compiler_params=pltpu.CompilerParams(
            dimension_semantics=("parallel",)),
    )(*resident, cond, tgt, nz)

    num_pixel = B * 2 * H * W
    # padded lanes (if any) are sliced off before the final reduce
    return jnp.sum(partial[0, :P]) / num_pixel


# ----------------------------------------------------------------------------
# Pure-JAX reference (same math, f32, no Pallas) for correctness check.
# ----------------------------------------------------------------------------
def ref_forward(batch, params_mag, params_ph, alpha_mag, alpha_ph, pe_table,
                t, noise_mag, noise_ph):
    observed_data = batch["observed_data"]
    target_data = batch["target_data"]
    B, _, H, W = observed_data.shape
    P = H * W

    pe = pe_table[t]                                                   # (B, D)

    def emb(p):
        h = jax.nn.silu(pe @ p["We1"].T + p["be1"][:, 0][None, :])
        h = jax.nn.silu(h @ p["We2"].T + p["be2"][:, 0][None, :])
        return h @ p["Wp"].T + p["bp"][:, 0][None, :]                  # (B, C)

    def branch(cond, tgt, noise, alpha, e, p):
        a = alpha[t]
        noisy = (jnp.sqrt(a)[:, None] * tgt
                 + jnp.sqrt(1.0 - a)[:, None] * noise)                 # (B, P)
        x = jnp.stack([cond, noisy], axis=1)                           # (B, 2, P)
        h = (jnp.einsum("ci,bip->bcp", p["W1"], x)
             + p["b1"][:, 0][None, :, None] + e[:, :, None])
        h = jnp.maximum(h, 0.0)
        pred = jnp.einsum("c,bcp->bp", p["W2"][:, 0], h) + p["b2"][0, 0]
        return jnp.sum((noise - pred) ** 2)

    r = branch(observed_data[:, 0].reshape(B, P), target_data[:, 0].reshape(B, P),
               noise_mag.reshape(B, P), alpha_mag, emb(params_mag), params_mag)
    r += branch(observed_data[:, 1].reshape(B, P), target_data[:, 1].reshape(B, P),
                noise_ph.reshape(B, P), alpha_ph, emb(params_ph), params_ph)
    return r / (B * 2 * H * W)


# ----------------------------------------------------------------------------
if __name__ == "__main__":
    key = jax.random.PRNGKey(0)
    B, H, W, L, KGE = 2, 16, 8, 8, 16   # H*W = 128 -> one full lane row

    (k_obs, k_tgt, k_traf, k_kge, k_pm, k_pp, k_t, k_nm, k_np) = jax.random.split(key, 9)

    batch = {
        "bs_kge": jax.random.normal(k_kge, (B, KGE), jnp.float32),
        "observed_data": jax.random.normal(k_obs, (B, 2, H, W), jnp.float32),
        "target_data": jax.random.normal(k_tgt, (B, 2, H, W), jnp.float32),
        "target_traf": jax.random.normal(k_traf, (B, L), jnp.float32),
    }

    params_mag = init_diffmodel_params(k_pm)
    params_ph = init_diffmodel_params(k_pp)
    alpha_mag, alpha_ph = make_beta_alpha(CONFIG["diffusion"])

    num_steps = CONFIG["diffusion"]["num_steps_freq"]
    pe_table = make_pe_table(num_steps)                 # built once
    packed = prepare_packed_params(params_mag, params_ph)   # stacked once

    t = jax.random.randint(k_t, (B,), 0, num_steps)
    noise_mag = jax.random.normal(k_nm, (B, H, W), jnp.float32)
    noise_ph = jax.random.normal(k_np, (B, H, W), jnp.float32)

    loss = csdi_base_forward(batch, packed, alpha_mag, alpha_ph, pe_table,
                             t, noise_mag, noise_ph)
    loss = jax.block_until_ready(loss)

    loss_ref = ref_forward(batch, params_mag, params_ph, alpha_mag, alpha_ph,
                           pe_table, t, noise_mag, noise_ph)
    loss_ref = jax.block_until_ready(loss_ref)

    # bf16 MXU operands with f32 accumulation -> slightly loosened tolerance
    assert np.allclose(np.asarray(loss), np.asarray(loss_ref),
                       rtol=2e-2, atol=2e-2), (float(loss), float(loss_ref))
    print("KERNEL_OK")
</pallas_src>

<mosaic_0001>
module attributes {stable_mosaic.version = 11 : i64} {
  func.func @_csdi_fused_kernel(%arg0: i32, %arg1: memref<128x2xbf16, #tpu.memory_space<vmem>>, %arg2: memref<256x128xbf16, #tpu.memory_space<vmem>>, %arg3: memref<2x128x128xbf16, #tpu.memory_space<vmem>>, %arg4: memref<2x32x128xbf16, #tpu.memory_space<vmem>>, %arg5: memref<2x128x8xf32, #tpu.memory_space<vmem>>, %arg6: memref<2x2x2xf32, #tpu.memory_space<vmem>>, %arg7: memref<2x2x128xf32, #tpu.memory_space<vmem>>, %arg8: memref<2x2x128xf32, #tpu.memory_space<vmem>>, %arg9: memref<2x2x128xf32, #tpu.memory_space<vmem>>, %arg10: memref<1x128xf32, #tpu.memory_space<vmem>>) attributes {dimension_semantics = [#tpu.dimension_semantics<parallel>], iteration_bounds = array<i64: 1>, scalar_prefetch = 0 : i64, scratch_operands = 0 : i64, tpu.core_type = #tpu.core_type<tc>, window_params = [{pipeline_mode = #tpu.pipeline_mode<synchronous>, transform_indices = @transform_0, window_bounds = array<i64: 128, 2>}, {pipeline_mode = #tpu.pipeline_mode<synchronous>, transform_indices = @transform_1, window_bounds = array<i64: 256, 128>}, {pipeline_mode = #tpu.pipeline_mode<synchronous>, transform_indices = @transform_2, window_bounds = array<i64: 2, 128, 128>}, {pipeline_mode = #tpu.pipeline_mode<synchronous>, transform_indices = @transform_3, window_bounds = array<i64: 2, 32, 128>}, {pipeline_mode = #tpu.pipeline_mode<synchronous>, transform_indices = @transform_4, window_bounds = array<i64: 2, 128, 8>}, {pipeline_mode = #tpu.pipeline_mode<synchronous>, transform_indices = @transform_5, window_bounds = array<i64: 2, 2, 2>}, {transform_indices = @transform_6, window_bounds = array<i64: 2, 2, 128>}, {transform_indices = @transform_7, window_bounds = array<i64: 2, 2, 128>}, {transform_indices = @transform_8, window_bounds = array<i64: 2, 2, 128>}, {transform_indices = @transform_9, window_bounds = array<i64: 1, 128>}]} {
    %c0 = arith.constant 0 : index
    %c0_0 = arith.constant 0 : index
    %0 = vector.load %arg1[%c0, %c0_0] : memref<128x2xbf16, #tpu.memory_space<vmem>>, vector<128x2xbf16>
    %c0_1 = arith.constant 0 : index
    %c0_2 = arith.constant 0 : index
    %1 = vector.load %arg2[%c0_1, %c0_2] : memref<256x128xbf16, #tpu.memory_space<vmem>>, vector<256x128xbf16>
    %cst = arith.constant dense<0.000000e+00> : vector<256x2xf32>
    %2 = tpu.matmul %1, %0, %cst {dimension_numbers = #tpu.dot_dimension_numbers<[1], [0], [0], [1], [0, 0, 1, 1], [], []>} : vector<256x128xbf16>, vector<128x2xbf16>, vector<256x2xf32> -> vector<256x2xf32>
    %c0_3 = arith.constant 0 : index
    %c0_4 = arith.constant 0 : index
    %c0_5 = arith.constant 0 : index
    %3 = vector.load %arg5[%c0_3, %c0_4, %c0_5] : memref<2x128x8xf32, #tpu.memory_space<vmem>>, vector<1x128x8xf32>
    %4 = vector.shape_cast %3 : vector<1x128x8xf32> to vector<128x8xf32>
    %5 = vector.extract_strided_slice %4 {offsets = [0, 0], sizes = [128, 1], strides = [1, 1]} : vector<128x8xf32> to vector<128x1xf32>
    %6 = vector.extract_strided_slice %4 {offsets = [0, 1], sizes = [128, 1], strides = [1, 1]} : vector<128x8xf32> to vector<128x1xf32>
    %7 = vector.extract_strided_slice %4 {offsets = [0, 2], sizes = [32, 1], strides = [1, 1]} : vector<128x8xf32> to vector<32x1xf32>
    %8 = vector.extract_strided_slice %4 {offsets = [0, 3], sizes = [32, 1], strides = [1, 1]} : vector<128x8xf32> to vector<32x1xf32>
    %9 = vector.extract_strided_slice %4 {offsets = [0, 4], sizes = [32, 1], strides = [1, 1]} : vector<128x8xf32> to vector<32x1xf32>
    %10 = vector.extract_strided_slice %4 {offsets = [0, 5], sizes = [32, 1], strides = [1, 1]} : vector<128x8xf32> to vector<32x1xf32>
    %11 = vector.extract_strided_slice %4 {offsets = [0, 6], sizes = [32, 1], strides = [1, 1]} : vector<128x8xf32> to vector<32x1xf32>
    %12 = vector.extract_strided_slice %4 {offsets = [0, 7], sizes = [1, 1], strides = [1, 1]} : vector<128x8xf32> to vector<1x1xf32>
    %13 = vector.extract_strided_slice %2 {offsets = [0, 0], sizes = [128, 2], strides = [1, 1]} : vector<256x2xf32> to vector<128x2xf32>
    %14 = vector.broadcast %5 : vector<128x1xf32> to vector<128x2xf32>
    %15 = arith.addf %13, %14 : vector<128x2xf32>
    %16 = arith.negf %15 : vector<128x2xf32>
    %17 = math.exp %16 : vector<128x2xf32>
    %cst_6 = arith.constant 1.000000e+00 : f32
    %18 = vector.broadcast %cst_6 : f32 to vector<128x2xf32>
    %19 = arith.addf %18, %17 : vector<128x2xf32>
    %20 = arith.divf %18, %19 : vector<128x2xf32>
    %21 = arith.mulf %15, %20 : vector<128x2xf32>
    %c0_7 = arith.constant 0 : index
    %c0_8 = arith.constant 0 : index
    %c0_9 = arith.constant 0 : index
    %22 = vector.load %arg3[%c0_7, %c0_8, %c0_9] : memref<2x128x128xbf16, #tpu.memory_space<vmem>>, vector<1x128x128xbf16>
    %23 = vector.shape_cast %22 : vector<1x128x128xbf16> to vector<128x128xbf16>
    %24 = arith.truncf %21 : vector<128x2xf32> to vector<128x2xbf16>
    %cst_10 = arith.constant dense<0.000000e+00> : vector<128x2xf32>
    %25 = tpu.matmul %23, %24, %cst_10 {dimension_numbers = #tpu.dot_dimension_numbers<[1], [0], [0], [1], [0, 0, 1, 1], [], []>} : vector<128x128xbf16>, vector<128x2xbf16>, vector<128x2xf32> -> vector<128x2xf32>
    %26 = vector.broadcast %6 : vector<128x1xf32> to vector<128x2xf32>
    %27 = arith.addf %25, %26 : vector<128x2xf32>
    %28 = arith.negf %27 : vector<128x2xf32>
    %29 = math.exp %28 : vector<128x2xf32>
    %cst_11 = arith.constant 1.000000e+00 : f32
    %30 = vector.broadcast %cst_11 : f32 to vector<128x2xf32>
    %31 = arith.addf %30, %29 : vector<128x2xf32>
    %32 = arith.divf %30, %31 : vector<128x2xf32>
    %33 = arith.mulf %27, %32 : vector<128x2xf32>
    %c0_12 = arith.constant 0 : index
    %c0_13 = arith.constant 0 : index
    %c0_14 = arith.constant 0 : index
    %34 = vector.load %arg4[%c0_12, %c0_13, %c0_14] : memref<2x32x128xbf16, #tpu.memory_space<vmem>>, vector<1x32x128xbf16>
    %35 = vector.shape_cast %34 : vector<1x32x128xbf16> to vector<32x128xbf16>
    %36 = arith.truncf %33 : vector<128x2xf32> to vector<128x2xbf16>
    %cst_15 = arith.constant dense<0.000000e+00> : vector<32x2xf32>
    %37 = tpu.matmul %35, %36, %cst_15 {dimension_numbers = #tpu.dot_dimension_numbers<[1], [0], [0], [1], [0, 0, 1, 1], [], []>} : vector<32x128xbf16>, vector<128x2xbf16>, vector<32x2xf32> -> vector<32x2xf32>
    %38 = vector.broadcast %7 : vector<32x1xf32> to vector<32x2xf32>
    %39 = arith.addf %37, %38 : vector<32x2xf32>
    %c0_16 = arith.constant 0 : index
    %c0_17 = arith.constant 0 : index
    %c0_18 = arith.constant 0 : index
    %40 = vector.load %arg7[%c0_16, %c0_17, %c0_18] : memref<2x2x128xf32, #tpu.memory_space<vmem>>, vector<1x2x128xf32>
    %41 = vector.shape_cast %40 : vector<1x2x128xf32> to vector<2x128xf32>
    %c0_19 = arith.constant 0 : index
    %c0_20 = arith.constant 0 : index
    %c0_21 = arith.constant 0 : index
    %42 = vector.load %arg8[%c0_19, %c0_20, %c0_21] : memref<2x2x128xf32, #tpu.memory_space<vmem>>, vector<1x2x128xf32>
    %43 = vector.shape_cast %42 : vector<1x2x128xf32> to vector<2x128xf32>
    %c0_22 = arith.constant 0 : index
    %c0_23 = arith.constant 0 : index
    %c0_24 = arith.constant 0 : index
    %44 = vector.load %arg9[%c0_22, %c0_23, %c0_24] : memref<2x2x128xf32, #tpu.memory_space<vmem>>, vector<1x2x128xf32>
    %45 = vector.shape_cast %44 : vector<1x2x128xf32> to vector<2x128xf32>
    %c0_25 = arith.constant 0 : index
    %c0_26 = arith.constant 0 : index
    %c0_27 = arith.constant 0 : index
    %46 = vector.load %arg6[%c0_25, %c0_26, %c0_27] : memref<2x2x2xf32, #tpu.memory_space<vmem>>, vector<1x2x2xf32>
    %47 = vector.shape_cast %46 : vector<1x2x2xf32> to vector<2x2xf32>
    %48 = vector.extract_strided_slice %47 {offsets = [0, 0], sizes = [2, 1], strides = [1, 1]} : vector<2x2xf32> to vector<2x1xf32>
    %49 = vector.broadcast %48 : vector<2x1xf32> to vector<2x128xf32>
    %50 = arith.mulf %49, %43 : vector<2x128xf32>
    %51 = vector.extract_strided_slice %47 {offsets = [0, 1], sizes = [2, 1], strides = [1, 1]} : vector<2x2xf32> to vector<2x1xf32>
    %52 = vector.broadcast %51 : vector<2x1xf32> to vector<2x128xf32>
    %53 = arith.mulf %52, %45 : vector<2x128xf32>
    %54 = arith.addf %50, %53 : vector<2x128xf32>
    %55 = vector.extract_strided_slice %39 {offsets = [0, 0], sizes = [32, 1], strides = [1, 1]} : vector<32x2xf32> to vector<32x1xf32>
    %56 = arith.addf %55, %8 : vector<32x1xf32>
    %57 = vector.extract_strided_slice %39 {offsets = [0, 1], sizes = [32, 1], strides = [1, 1]} : vector<32x2xf32> to vector<32x1xf32>
    %58 = arith.addf %57, %8 : vector<32x1xf32>
    %59 = vector.shape_cast %56 : vector<32x1xf32> to vector<1x32x1xf32>
    %60 = vector.shape_cast %58 : vector<32x1xf32> to vector<1x32x1xf32>
    %61 = tpu.concatenate %59, %60 in 0 : vector<1x32x1xf32>, vector<1x32x1xf32> -> vector<2x32x1xf32>
    %62 = vector.shape_cast %10 : vector<32x1xf32> to vector<1x32x1xf32>
    %63 = vector.shape_cast %41 : vector<2x128xf32> to vector<2x1x128xf32>
    %64 = vector.broadcast %62 : vector<1x32x1xf32> to vector<2x32x128xf32>
    %65 = vector.broadcast %63 : vector<2x1x128xf32> to vector<2x32x128xf32>
    %66 = arith.mulf %64, %65 : vector<2x32x128xf32>
    %67 = vector.shape_cast %11 : vector<32x1xf32> to vector<1x32x1xf32>
    %68 = vector.shape_cast %54 : vector<2x128xf32> to vector<2x1x128xf32>
    %69 = vector.broadcast %67 : vector<1x32x1xf32> to vector<2x32x128xf32>
    %70 = vector.broadcast %68 : vector<2x1x128xf32> to vector<2x32x128xf32>
    %71 = arith.mulf %69, %70 : vector<2x32x128xf32>
    %72 = arith.addf %66, %71 : vector<2x32x128xf32>
    %73 = vector.broadcast %61 : vector<2x32x1xf32> to vector<2x32x128xf32>
    %74 = arith.addf %72, %73 : vector<2x32x128xf32>
    %cst_28 = arith.constant 0.000000e+00 : f32
    %75 = vector.broadcast %cst_28 : f32 to vector<2x32x128xf32>
    %76 = arith.maximumf %74, %75 : vector<2x32x128xf32>
    %77 = vector.shape_cast %9 : vector<32x1xf32> to vector<1x32x1xf32>
    %78 = vector.broadcast %77 : vector<1x32x1xf32> to vector<2x32x128xf32>
    %79 = arith.mulf %76, %78 : vector<2x32x128xf32>
    %cst_29 = arith.constant dense<0.000000e+00> : vector<2x128xf32>
    %80 = vector.multi_reduction <add>, %79, %cst_29 [1] : vector<2x32x128xf32> to vector<2x128xf32>
    %81 = vector.broadcast %12 : vector<1x1xf32> to vector<2x128xf32>
    %82 = arith.addf %80, %81 : vector<2x128xf32>
    %83 = arith.subf %45, %82 : vector<2x128xf32>
    %84 = arith.mulf %83, %83 : vector<2x128xf32>
    %cst_30 = arith.constant dense<0.000000e+00> : vector<128xf32>
    %85 = vector.multi_reduction <add>, %84, %cst_30 [0] : vector<2x128xf32> to vector<128xf32>
    %86 = vector.shape_cast %85 : vector<128xf32> to vector<1x128xf32>
    %c1 = arith.constant 1 : index
    %c0_31 = arith.constant 0 : index
    %c0_32 = arith.constant 0 : index
    %87 = vector.load %arg5[%c1, %c0_31, %c0_32] : memref<2x128x8xf32, #tpu.memory_space<vmem>>, vector<1x128x8xf32>
    %88 = vector.shape_cast %87 : vector<1x128x8xf32> to vector<128x8xf32>
    %89 = vector.extract_strided_slice %88 {offsets = [0, 0], sizes = [128, 1], strides = [1, 1]} : vector<128x8xf32> to vector<128x1xf32>
    %90 = vector.extract_strided_slice %88 {offsets = [0, 1], sizes = [128, 1], strides = [1, 1]} : vector<128x8xf32> to vector<128x1xf32>
    %91 = vector.extract_strided_slice %88 {offsets = [0, 2], sizes = [32, 1], strides = [1, 1]} : vector<128x8xf32> to vector<32x1xf32>
    %92 = vector.extract_strided_slice %88 {offsets = [0, 3], sizes = [32, 1], strides = [1, 1]} : vector<128x8xf32> to vector<32x1xf32>
    %93 = vector.extract_strided_slice %88 {offsets = [0, 4], sizes = [32, 1], strides = [1, 1]} : vector<128x8xf32> to vector<32x1xf32>
    %94 = vector.extract_strided_slice %88 {offsets = [0, 5], sizes = [32, 1], strides = [1, 1]} : vector<128x8xf32> to vector<32x1xf32>
    %95 = vector.extract_strided_slice %88 {offsets = [0, 6], sizes = [32, 1], strides = [1, 1]} : vector<128x8xf32> to vector<32x1xf32>
    %96 = vector.extract_strided_slice %88 {offsets = [0, 7], sizes = [1, 1], strides = [1, 1]} : vector<128x8xf32> to vector<1x1xf32>
    %97 = vector.extract_strided_slice %2 {offsets = [128, 0], sizes = [128, 2], strides = [1, 1]} : vector<256x2xf32> to vector<128x2xf32>
    %98 = vector.broadcast %89 : vector<128x1xf32> to vector<128x2xf32>
    %99 = arith.addf %97, %98 : vector<128x2xf32>
    %100 = arith.negf %99 : vector<128x2xf32>
    %101 = math.exp %100 : vector<128x2xf32>
    %cst_33 = arith.constant 1.000000e+00 : f32
    %102 = vector.broadcast %cst_33 : f32 to vector<128x2xf32>
    %103 = arith.addf %102, %101 : vector<128x2xf32>
    %104 = arith.divf %102, %103 : vector<128x2xf32>
    %105 = arith.mulf %99, %104 : vector<128x2xf32>
    %c1_34 = arith.constant 1 : index
    %c0_35 = arith.constant 0 : index
    %c0_36 = arith.constant 0 : index
    %106 = vector.load %arg3[%c1_34, %c0_35, %c0_36] : memref<2x128x128xbf16, #tpu.memory_space<vmem>>, vector<1x128x128xbf16>
    %107 = vector.shape_cast %106 : vector<1x128x128xbf16> to vector<128x128xbf16>
    %108 = arith.truncf %105 : vector<128x2xf32> to vector<128x2xbf16>
    %cst_37 = arith.constant dense<0.000000e+00> : vector<128x2xf32>
    %109 = tpu.matmul %107, %108, %cst_37 {dimension_numbers = #tpu.dot_dimension_numbers<[1], [0], [0], [1], [0, 0, 1, 1], [], []>} : vector<128x128xbf16>, vector<128x2xbf16>, vector<128x2xf32> -> vector<128x2xf32>
    %110 = vector.broadcast %90 : vector<128x1xf32> to vector<128x2xf32>
    %111 = arith.addf %109, %110 : vector<128x2xf32>
    %112 = arith.negf %111 : vector<128x2xf32>
    %113 = math.exp %112 : vector<128x2xf32>
    %cst_38 = arith.constant 1.000000e+00 : f32
    %114 = vector.broadcast %cst_38 : f32 to vector<128x2xf32>
    %115 = arith.addf %114, %113 : vector<128x2xf32>
    %116 = arith.divf %114, %115 : vector<128x2xf32>
    %117 = arith.mulf %111, %116 : vector<128x2xf32>
    %c1_39 = arith.constant 1 : index
    %c0_40 = arith.constant 0 : index
    %c0_41 = arith.constant 0 : index
    %118 = vector.load %arg4[%c1_39, %c0_40, %c0_41] : memref<2x32x128xbf16, #tpu.memory_space<vmem>>, vector<1x32x128xbf16>
    %119 = vector.shape_cast %118 : vector<1x32x128xbf16> to vector<32x128xbf16>
    %120 = arith.truncf %117 : vector<128x2xf32> to vector<128x2xbf16>
    %cst_42 = arith.constant dense<0.000000e+00> : vector<32x2xf32>
    %121 = tpu.matmul %119, %120, %cst_42 {dimension_numbers = #tpu.dot_dimension_numbers<[1], [0], [0], [1], [0, 0, 1, 1], [], []>} : vector<32x128xbf16>, vector<128x2xbf16>, vector<32x2xf32> -> vector<32x2xf32>
    %122 = vector.broadcast %91 : vector<32x1xf32> to vector<32x2xf32>
    %123 = arith.addf %121, %122 : vector<32x2xf32>
    %c1_43 = arith.constant 1 : index
    %c0_44 = arith.constant 0 : index
    %c0_45 = arith.constant 0 : index
    %124 = vector.load %arg7[%c1_43, %c0_44, %c0_45] : memref<2x2x128xf32, #tpu.memory_space<vmem>>, vector<1x2x128xf32>
    %125 = vector.shape_cast %124 : vector<1x2x128xf32> to vector<2x128xf32>
    %c1_46 = arith.constant 1 : index
    %c0_47 = arith.constant 0 : index
    %c0_48 = arith.constant 0 : index
    %126 = vector.load %arg8[%c1_46, %c0_47, %c0_48] : memref<2x2x128xf32, #tpu.memory_space<vmem>>, vector<1x2x128xf32>
    %127 = vector.shape_cast %126 : vector<1x2x128xf32> to vector<2x128xf32>
    %c1_49 = arith.constant 1 : index
    %c0_50 = arith.constant 0 : index
    %c0_51 = arith.constant 0 : index
    %128 = vector.load %arg9[%c1_49, %c0_50, %c0_51] : memref<2x2x128xf32, #tpu.memory_space<vmem>>, vector<1x2x128xf32>
    %129 = vector.shape_cast %128 : vector<1x2x128xf32> to vector<2x128xf32>
    %c1_52 = arith.constant 1 : index
    %c0_53 = arith.constant 0 : index
    %c0_54 = arith.constant 0 : index
    %130 = vector.load %arg6[%c1_52, %c0_53, %c0_54] : memref<2x2x2xf32, #tpu.memory_space<vmem>>, vector<1x2x2xf32>
    %131 = vector.shape_cast %130 : vector<1x2x2xf32> to vector<2x2xf32>
    %132 = vector.extract_strided_slice %131 {offsets = [0, 0], sizes = [2, 1], strides = [1, 1]} : vector<2x2xf32> to vector<2x1xf32>
    %133 = vector.broadcast %132 : vector<2x1xf32> to vector<2x128xf32>
    %134 = arith.mulf %133, %127 : vector<2x128xf32>
    %135 = vector.extract_strided_slice %131 {offsets = [0, 1], sizes = [2, 1], strides = [1, 1]} : vector<2x2xf32> to vector<2x1xf32>
    %136 = vector.broadcast %135 : vector<2x1xf32> to vector<2x128xf32>
    %137 = arith.mulf %136, %129 : vector<2x128xf32>
    %138 = arith.addf %134, %137 : vector<2x128xf32>
    %139 = vector.extract_strided_slice %123 {offsets = [0, 0], sizes = [32, 1], strides = [1, 1]} : vector<32x2xf32> to vector<32x1xf32>
    %140 = arith.addf %139, %92 : vector<32x1xf32>
    %141 = vector.extract_strided_slice %123 {offsets = [0, 1], sizes = [32, 1], strides = [1, 1]} : vector<32x2xf32> to vector<32x1xf32>
    %142 = arith.addf %141, %92 : vector<32x1xf32>
    %143 = vector.shape_cast %140 : vector<32x1xf32> to vector<1x32x1xf32>
    %144 = vector.shape_cast %142 : vector<32x1xf32> to vector<1x32x1xf32>
    %145 = tpu.concatenate %143, %144 in 0 : vector<1x32x1xf32>, vector<1x32x1xf32> -> vector<2x32x1xf32>
    %146 = vector.shape_cast %94 : vector<32x1xf32> to vector<1x32x1xf32>
    %147 = vector.shape_cast %125 : vector<2x128xf32> to vector<2x1x128xf32>
    %148 = vector.broadcast %146 : vector<1x32x1xf32> to vector<2x32x128xf32>
    %149 = vector.broadcast %147 : vector<2x1x128xf32> to vector<2x32x128xf32>
    %150 = arith.mulf %148, %149 : vector<2x32x128xf32>
    %151 = vector.shape_cast %95 : vector<32x1xf32> to vector<1x32x1xf32>
    %152 = vector.shape_cast %138 : vector<2x128xf32> to vector<2x1x128xf32>
    %153 = vector.broadcast %151 : vector<1x32x1xf32> to vector<2x32x128xf32>
    %154 = vector.broadcast %152 : vector<2x1x128xf32> to vector<2x32x128xf32>
    %155 = arith.mulf %153, %154 : vector<2x32x128xf32>
    %156 = arith.addf %150, %155 : vector<2x32x128xf32>
    %157 = vector.broadcast %145 : vector<2x32x1xf32> to vector<2x32x128xf32>
    %158 = arith.addf %156, %157 : vector<2x32x128xf32>
    %cst_55 = arith.constant 0.000000e+00 : f32
    %159 = vector.broadcast %cst_55 : f32 to vector<2x32x128xf32>
    %160 = arith.maximumf %158, %159 : vector<2x32x128xf32>
    %161 = vector.shape_cast %93 : vector<32x1xf32> to vector<1x32x1xf32>
    %162 = vector.broadcast %161 : vector<1x32x1xf32> to vector<2x32x128xf32>
    %163 = arith.mulf %160, %162 : vector<2x32x128xf32>
    %cst_56 = arith.constant dense<0.000000e+00> : vector<2x128xf32>
    %164 = vector.multi_reduction <add>, %163, %cst_56 [1] : vector<2x32x128xf32> to vector<2x128xf32>
    %165 = vector.broadcast %96 : vector<1x1xf32> to vector<2x128xf32>
    %166 = arith.addf %164, %165 : vector<2x128xf32>
    %167 = arith.subf %129, %166 : vector<2x128xf32>
    %168 = arith.mulf %167, %167 : vector<2x128xf32>
    %cst_57 = arith.constant dense<0.000000e+00> : vector<128xf32>
    %169 = vector.multi_reduction <add>, %168, %cst_57 [0] : vector<2x128xf32> to vector<128xf32>
    %170 = vector.shape_cast %169 : vector<128xf32> to vector<1x128xf32>
    %171 = arith.addf %86, %170 : vector<1x128xf32>
    %c0_58 = arith.constant 0 : index
    %c0_59 = arith.constant 0 : index
    %172 = vector.load %arg10[%c0_58, %c0_59] : memref<1x128xf32, #tpu.memory_space<vmem>>, vector<1x128xf32>
    tpu.vector_store %arg10[%c0_58, %c0_59], %171 {strides = array<i32>} : memref<1x128xf32, #tpu.memory_space<vmem>>, vector<1x128xf32>,
    return
  }
  func.func @transform_0(%arg0: i32) -> (i32, i32) {
    %c0_i32 = arith.constant 0 : i32
    %c0_i32_0 = arith.constant 0 : i32
    %c0_i32_1 = arith.constant 0 : i32
    return %c0_i32, %c0_i32_0 : i32, i32
  }
  func.func @transform_1(%arg0: i32) -> (i32, i32) {
    %c0_i32 = arith.constant 0 : i32
    %c0_i32_0 = arith.constant 0 : i32
    %c0_i32_1 = arith.constant 0 : i32
    return %c0_i32, %c0_i32_0 : i32, i32
  }
  func.func @transform_2(%arg0: i32) -> (i32, i32, i32) {
    %c0_i32 = arith.constant 0 : i32
    %c0_i32_0 = arith.constant 0 : i32
    %c0_i32_1 = arith.constant 0 : i32
    %c0_i32_2 = arith.constant 0 : i32
    return %c0_i32, %c0_i32_0, %c0_i32_1 : i32, i32, i32
  }
  func.func @transform_3(%arg0: i32) -> (i32, i32, i32) {
    %c0_i32 = arith.constant 0 : i32
    %c0_i32_0 = arith.constant 0 : i32
    %c0_i32_1 = arith.constant 0 : i32
    %c0_i32_2 = arith.constant 0 : i32
    return %c0_i32, %c0_i32_0, %c0_i32_1 : i32, i32, i32
  }
  func.func @transform_4(%arg0: i32) -> (i32, i32, i32) {
    %c0_i32 = arith.constant 0 : i32
    %c0_i32_0 = arith.constant 0 : i32
    %c0_i32_1 = arith.constant 0 : i32
    %c0_i32_2 = arith.constant 0 : i32
    return %c0_i32, %c0_i32_0, %c0_i32_1 : i32, i32, i32
  }
  func.func @transform_5(%arg0: i32) -> (i32, i32, i32) {
    %c0_i32 = arith.constant 0 : i32
    %c0_i32_0 = arith.constant 0 : i32
    %c0_i32_1 = arith.constant 0 : i32
    %c0_i32_2 = arith.constant 0 : i32
    return %c0_i32, %c0_i32_0, %c0_i32_1 : i32, i32, i32
  }
  func.func @transform_6(%arg0: i32) -> (i32, i32, i32) {
    %c0_i32 = arith.constant 0 : i32
    %c0_i32_0 = arith.constant 0 : i32
    %c0_i32_1 = arith.constant 0 : i32
    return %c0_i32, %c0_i32_0, %arg0 : i32, i32, i32
  }
  func.func @transform_7(%arg0: i32) -> (i32, i32, i32) {
    %c0_i32 = arith.constant 0 : i32
    %c0_i32_0 = arith.constant 0 : i32
    %c0_i32_1 = arith.constant 0 : i32
    return %c0_i32, %c0_i32_0, %arg0 : i32, i32, i32
  }
  func.func @transform_8(%arg0: i32) -> (i32, i32, i32) {
    %c0_i32 = arith.constant 0 : i32
    %c0_i32_0 = arith.constant 0 : i32
    %c0_i32_1 = arith.constant 0 : i32
    return %c0_i32, %c0_i32_0, %arg0 : i32, i32, i32
  }
  func.func @transform_9(%arg0: i32) -> (i32, i32) {
    %c0_i32 = arith.constant 0 : i32
    %c0_i32_0 = arith.constant 0 : i32
    return %c0_i32, %arg0 : i32, i32
  }
}

</mosaic_0001>

<bundles_post_ra>
// kernel: csdi_base_forward.1
= control target key start
LH: loop header
LB: loop body
LE: loop exit
PB: predicated region body
PF: predicated region fallthrough
CT: control target
= control target key end

     0   :  { %v3041_v1 = vmov 0   ;;  %v3042_v60 = vmov 1   ;;  %s3044_s30 = smov 126   ;;  %s3046_s15 = smov 125   ;;  %vm1329_vm0 = vcmask 1041409   ;;  %vm1334_vm1 = vcmask 1041408   ;;  %s4155_s0 = inlined_call_operand.vmem [shape: bf16[128,2], index: 0, kind: input, shape index: {}]   ;;  %s4156_s1 = inlined_call_operand.vmem [shape: bf16[256,128], index: 1, kind: input, shape index: {}]   ;;  %s4157_s4 = inlined_call_operand.vmem [shape: f32[2,128,8], index: 4, kind: input, shape index: {}]   ;;  %s4158_s2 = inlined_call_operand.vmem [shape: bf16[2,128,128], index: 2, kind: input, shape index: {}]   ;;  %s4159_s3 = inlined_call_operand.vmem [shape: bf16[2,32,128], index: 3, kind: input, shape index: {}]   ;;  %s4160_s5 = inlined_call_operand.vmem [shape: f32[2,2,2], index: 5, kind: input, shape index: {}]   ;;  %s4161_s6 = inlined_call_operand.vmem [shape: f32[2,2,128], index: 6, kind: input, shape index: {}]   ;;  %s4162_s8 = inlined_call_operand.vmem [shape: f32[2,2,128], index: 8, kind: input, shape index: {}]   ;;  %s4163_s7 = inlined_call_operand.vmem [shape: f32[2,2,128], index: 7, kind: input, shape index: {}]   ;;  %s4164_s9 = inlined_call_operand.vmem [shape: f32[1,128], index: 9, kind: output, shape index: {}]  }
   0x1   :  { %v2728_v0 = vld [vmem:[%s4155_s0] sm:$0xff]   ;;  %2703 = vset.pattern.permute.xlu1 %v3041_v1  ;;  %2702 = vset.pattern.permute.xlu0 %v3041_v1  ;;  %v2729_v2 = vld [vmem:[%s4155_s0 + $0x8] sm:$0xff]   ;;  %v2730_v3 = vld [vmem:[%s4155_s0 + $0x10] sm:$0xff]   ;;  %s3047_s18 = smov 121  }
   0x2   :  { %2535 = vmatprep.subr.bf16.mxu0 %v2728_v0  ;;  %v2731_v4 = vld [vmem:[%s4155_s0 + $0x18] sm:$0xff]   ;;  %v2736_v5 = vld [vmem:[%s4156_s1] sm:$0xff]   ;;  %v2733_v7 = vld [vmem:[%s4155_s0 + $0x28] sm:$0xff]  }
   0x3   :  { %2536 = vmatpush3.bf16.msra.mxu0 %v2728_v0  ;;  %2551 = vmatprep.mubr.bf16.mxu0 %v2736_v5  ;;  %v2732_v6 = vld [vmem:[%s4155_s0 + $0x20] sm:$0xff]   ;;  %v3128_v8 = vld [vmem:[%s4157_s4 + $0x10] sm:$0xff]  ;;  %v3140_v10 = vld [vmem:[%s4157_s4 + $0x18] sm:$0xff] }
   0x4   :  { %2537 = vmatprep.subr.bf16.mxu0 %v2729_v2  ;;  %v3133_v9 = vld [vmem:[%s4157_s4] sm:$0xff]  ;;  %414 = vperm.xlu1 %2703, %v3128_v8   ;;  %v3145_v11 = vld [vmem:[%s4157_s4 + $0x8] sm:$0xff]  ;;  %v2734_v12 = vld [vmem:[%s4155_s0 + $0x30] sm:$0xff]  }
   0x5   :  { %404 = vperm.xlu0 %2702, %v3133_v9   ;;  %v3155_v13 = vld [vmem:[%s4157_s4 + $0x28] sm:$0xff]  ;;  %v3160_v14 = vld [vmem:[%s4157_s4 + $0x20] sm:$0xff]  ;;  %v2735_v15 = vld [vmem:[%s4155_s0 + $0x38] sm:$0xff]  }
   0x6   :  { %v3170_v16 = vld [vmem:[%s4157_s4 + $0x38] sm:$0xff]  ;;  %v3175_v17 = vld [vmem:[%s4157_s4 + $0x30] sm:$0xff]  ;;  %v2737_v18 = vld [vmem:[%s4156_s1 + $0x8] sm:$0xff]  }
   0x7   :  { %2538 = vmatpush3.bf16.msra.mxu0 %v2729_v2  ;;  %v3185_v19 = vld [vmem:[%s4157_s4 + $0x48] sm:$0xff]  ;;  %v3190_v20 = vld [vmem:[%s4157_s4 + $0x40] sm:$0xff]  ;;  %v2738_v21 = vld [vmem:[%s4156_s1 + $0x10] sm:$0xff]  }
   0x8   :  { %2539 = vmatprep.subr.bf16.mxu0 %v2730_v3  ;;  %419 = vperm.xlu1 %2703, %v3140_v10   ;;  %v3200_v22 = vld [vmem:[%s4157_s4 + $0x58] sm:$0xff]  ;;  %v3205_v23 = vld [vmem:[%s4157_s4 + $0x50] sm:$0xff]  ;;  %v3215_v25 = vld [vmem:[%s4157_s4 + $0x68] sm:$0xff] }
   0x9   :  { %409 = vperm.xlu0 %2702, %v3145_v11   ;;  %v2739_v24 = vld [vmem:[%s4156_s1 + $0x18] sm:$0xff]   ;;  %v3220_v26 = vld [vmem:[%s4157_s4 + $0x60] sm:$0xff]  ;;  %v3235_v29 = vld [vmem:[%s4157_s4 + $0x70] sm:$0xff] }
   0xa   :  { %v2740_v27 = vld [vmem:[%s4156_s1 + $0x20] sm:$0xff]   ;;  %v3230_v28 = vld [vmem:[%s4157_s4 + $0x78] sm:$0xff]  ;;  %v2741_v30 = vld [vmem:[%s4156_s1 + $0x28] sm:$0xff]  }
   0xb   :  { %2540 = vmatpush3.bf16.msra.mxu0 %v2730_v3  ;;  %v3245_v31 = vld [vmem:[%s4157_s4 + $0x88] sm:$0xff]  ;;  %v3250_v32 = vld [vmem:[%s4157_s4 + $0x80] sm:$0xff]  ;;  %v2742_v33 = vld [vmem:[%s4156_s1 + $0x30] sm:$0xff]  }
   0xc   :  { %2541 = vmatprep.subr.bf16.mxu0 %v2731_v4  ;;  %429 = vperm.xlu1 %2703, %v3155_v13   ;;  %v3260_v34 = vld [vmem:[%s4157_s4 + $0x98] sm:$0xff]  ;;  %v3265_v35 = vld [vmem:[%s4157_s4 + $0x90] sm:$0xff]  ;;  %v3275_v37 = vld [vmem:[%s4157_s4 + $0xa8] sm:$0xff] }
   0xd   :  { %424 = vperm.xlu0 %2702, %v3160_v14   ;;  %v2743_v36 = vld [vmem:[%s4156_s1 + $0x38] sm:$0xff]   ;;  %v3280_v38 = vld [vmem:[%s4157_s4 + $0xa0] sm:$0xff]  ;;  %v3295_v41 = vld [vmem:[%s4157_s4 + $0xb0] sm:$0xff] }
   0xe   :  { %v2744_v39 = vld [vmem:[%s4156_s1 + $0x40] sm:$0xff]   ;;  %v3290_v40 = vld [vmem:[%s4157_s4 + $0xb8] sm:$0xff]  ;;  %v2745_v42 = vld [vmem:[%s4156_s1 + $0x48] sm:$0xff]  }
   0xf   :  { %2542 = vmatpush3.bf16.msra.mxu0 %v2731_v4  ;;  %v3305_v43 = vld [vmem:[%s4157_s4 + $0xc8] sm:$0xff]  ;;  %v3310_v44 = vld [vmem:[%s4157_s4 + $0xc0] sm:$0xff]  ;;  %v2746_v45 = vld [vmem:[%s4156_s1 + $0x50] sm:$0xff]  }
  0x10   :  { %2543 = vmatprep.subr.bf16.mxu0 %v2732_v6  ;;  %439 = vperm.xlu1 %2703, %v3170_v16   ;;  %v3320_v46 = vld [vmem:[%s4157_s4 + $0xd8] sm:$0xff]  ;;  %v3325_v47 = vld [vmem:[%s4157_s4 + $0xd0] sm:$0xff]  ;;  %v3335_v49 = vld [vmem:[%s4157_s4 + $0xe8] sm:$0xff] }
  0x11   :  { %434 = vperm.xlu0 %2702, %v3175_v17   ;;  %v2747_v48 = vld [vmem:[%s4156_s1 + $0x58] sm:$0xff]   ;;  %v3340_v50 = vld [vmem:[%s4157_s4 + $0xe0] sm:$0xff]  ;;  %v3355_v53 = vld [vmem:[%s4157_s4 + $0xf0] sm:$0xff] }
  0x12   :  { %v2748_v51 = vld [vmem:[%s4156_s1 + $0x60] sm:$0xff]   ;;  %v3350_v52 = vld [vmem:[%s4157_s4 + $0xf8] sm:$0xff]  ;;  %v2749_v54 = vld [vmem:[%s4156_s1 + $0x68] sm:$0xff]  }
  0x13   :  { %2544 = vmatpush3.bf16.msra.mxu0 %v2732_v6  ;;  %v2750_v55 = vld [vmem:[%s4156_s1 + $0x70] sm:$0xff]   ;;  %v2751_v56 = vld [vmem:[%s4156_s1 + $0x78] sm:$0xff]   ;;  %v2752_v57 = vld [vmem:[%s4158_s2] sm:$0xff]  }
  0x14   :  { %2545 = vmatprep.subr.bf16.mxu0 %v2733_v7  ;;  %449 = vperm.xlu1 %2703, %v3185_v19   ;;  %v2760_v62 = vld [vmem:[%s4158_s2 + $0x40] sm:$0xff]  }
  0x15   :  { %444 = vperm.xlu0 %2702, %v3190_v20   ;;  %2599 = vmatprep.mubr.bf16.mxu1 %v2752_v57 }
  0x17   :  { %2546 = vmatpush3.bf16.msra.mxu0 %v2733_v7 }
  0x18   :  { %2547 = vmatprep.subr.bf16.mxu0 %v2734_v12  ;;  %459 = vperm.xlu1 %2703, %v3200_v22  }
  0x19   :  { %454 = vperm.xlu0 %2702, %v3205_v23  }
  0x1b   :  { %2548 = vmatpush3.bf16.msra.mxu0 %v2734_v12 }
  0x1c   :  { %2549 = vmatprep.subr.bf16.mxu0 %v2735_v15  ;;  %469 = vperm.xlu1 %2703, %v3215_v25  }
  0x1d   :  { %464 = vperm.xlu0 %2702, %v3220_v26  }
  0x1f   :  { %2550 = vmatpush3.bf16.msra.mxu0 %v2735_v15 }
  0x20   :  { %479 = vperm.xlu1 %2703, %v3230_v28  }
  0x21   :  { %474 = vperm.xlu0 %2702, %v3235_v29  }
  0x22   :  { %2552 = vmatmul.mubr.bf16.vlgmr.msra.gmra.mrb[0].mxu0 %v2737_v18 }
  0x23   :  { %2555 = vmatprep.mubr.bf16.mxu0 %v2738_v21 }
  0x24   :  { %1366 = vperm.xlu1 %2703, %v3245_v31  }
  0x25   :  { %1361 = vperm.xlu0 %2702, %v3250_v32  }
  0x28   :  { %1376 = vperm.xlu1 %2703, %v3260_v34  }
  0x29   :  { %1371 = vperm.xlu0 %2702, %v3265_v35  }
  0x2a   :  { %2556 = vmatmul.mubr.bf16.gmra.mrb[4].mxu0 %v2739_v24 }
  0x2b   :  { %2559 = vmatprep.mubr.bf16.mxu0 %v2740_v27 }
  0x2c   :  { %1386 = vperm.xlu1 %2703, %v3275_v37  }
  0x2d   :  { %1381 = vperm.xlu0 %2702, %v3280_v38  }
  0x30   :  { %1396 = vperm.xlu1 %2703, %v3290_v40  }
  0x31   :  { %1391 = vperm.xlu0 %2702, %v3295_v41  }
  0x32   :  { %2560 = vmatmul.mubr.bf16.gmra.mrb[8].mxu0 %v2741_v30 }
  0x33   :  { %2563 = vmatprep.mubr.bf16.mxu0 %v2742_v33 }
  0x34   :  { %1406 = vperm.xlu1 %2703, %v3305_v43  }
  0x35   :  { %1401 = vperm.xlu0 %2702, %v3310_v44  }
  0x38   :  { %1416 = vperm.xlu1 %2703, %v3320_v46  }
  0x39   :  { %1411 = vperm.xlu0 %2702, %v3325_v47  }
  0x3a   :  { %2564 = vmatmul.mubr.bf16.gmra.mrb[12].mxu0 %v2743_v36 }
  0x3b   :  { %2567 = vmatprep.mubr.bf16.mxu0 %v2744_v39 }
  0x3c   :  { %1426 = vperm.xlu1 %2703, %v3335_v49  }
  0x3d   :  { %1421 = vperm.xlu0 %2702, %v3340_v50  }
  0x40   :  { %1436 = vperm.xlu1 %2703, %v3350_v52  }
  0x41   :  { %1431 = vperm.xlu0 %2702, %v3355_v53  }
  0x42   :  { %2568 = vmatmul.mubr.bf16.gmra.mrb[16].mxu0 %v2745_v42 }
  0x43   :  { %2571 = vmatprep.mubr.bf16.mxu0 %v2746_v45 }
  0x44   :  { %2705 = vset.pattern.permute.xlu1 %v3042_v60 }
  0x45   :  { %2704 = vset.pattern.permute.xlu0 %v3042_v60  ;;  %639 = vperm.xlu1 %2705, %v3145_v11  }
  0x46   :  { %635 = vperm.xlu0 %2704, %v3133_v9  }
  0x49   :  { %643 = vperm.xlu1 %2705, %v3128_v8  }
  0x4a   :  { %2572 = vmatmul.mubr.bf16.gmra.mrb[20].mxu0 %v2747_v48  ;;  %647 = vperm.xlu0 %2704, %v3140_v10  }
  0x4b   :  { %2575 = vmatprep.mubr.bf16.mxu0 %v2748_v51 }
  0x4d   :  { %651 = vperm.xlu1 %2705, %v3160_v14  }
  0x4e   :  { %655 = vperm.xlu0 %2704, %v3155_v13  }
  0x51   :  { %659 = vperm.xlu1 %2705, %v3175_v17  }
  0x52   :  { %2576 = vmatmul.mubr.bf16.gmra.mrb[24].mxu0 %v2749_v54  ;;  %663 = vperm.xlu0 %2704, %v3170_v16  }
  0x53   :  { %2579 = vmatprep.mubr.bf16.mxu0 %v2750_v55 }
  0x55   :  { %667 = vperm.xlu1 %2705, %v3190_v20  }
  0x56   :  { %671 = vperm.xlu0 %2704, %v3185_v19  }
  0x59   :  { %675 = vperm.xlu1 %2705, %v3205_v23  }
  0x5a   :  { %2580 = vmatmul.mubr.bf16.gmra.mrb[28].mxu0 %v2751_v56  ;;  %679 = vperm.xlu0 %2704, %v3200_v22  }
  0x5b   :  { %2651 = vmatprep.mubr.bf16.mxu0 %v2760_v62 }
  0x5d   :  { %683 = vperm.xlu1 %2705, %v3220_v26  }
  0x5e   :  { %687 = vperm.xlu0 %2704, %v3215_v25  }
  0x61   :  { %691 = vperm.xlu1 %2705, %v3235_v29  }
  0x62   :  { %695 = vperm.xlu0 %2704, %v3230_v28  }
  0x65   :  { %1593 = vperm.xlu1 %2705, %v3250_v32  }
  0x66   :  { %1597 = vperm.xlu0 %2704, %v3245_v31  }
  0x69   :  { %1601 = vperm.xlu1 %2705, %v3265_v35  }
  0x6a   :  { %1605 = vperm.xlu0 %2704, %v3260_v34  }
  0x6d   :  { %1609 = vperm.xlu1 %2705, %v3280_v38  }
  0x6e   :  { %1613 = vperm.xlu0 %2704, %v3275_v37  }
  0x71   :  { %1617 = vperm.xlu1 %2705, %v3295_v41  }
  0x72   :  { %1621 = vperm.xlu0 %2704, %v3290_v40  }
  0x75   :  { %1625 = vperm.xlu1 %2705, %v3310_v44  }
  0x76   :  { %1629 = vperm.xlu0 %2704, %v3305_v43  }
  0x79   :  { %1633 = vperm.xlu1 %2705, %v3325_v47  }
  0x7a   :  { %1637 = vperm.xlu0 %2704, %v3320_v46  }
  0x7d   :  { %1641 = vperm.xlu1 %2705, %v3340_v50  }
  0x7e   :  { %1645 = vperm.xlu0 %2704, %v3335_v49  }
  0x81   :  { %1649 = vperm.xlu1 %2705, %v3355_v53  }
  0x82   :  { %1653 = vperm.xlu0 %2704, %v3350_v52  }
  0x83   :  { %v415_v59 = vpop.permute.xlu1 %414 }
  0x84   :  { %v405_v58 = vpop.permute.xlu0 %404 }
  0x87   :  { %v420_v63 = vpop.permute.xlu1 %419 }
  0x88   :  { %v410_v61 = vpop.permute.xlu0 %409 }
  0x8b   :  { %v430_v2 = vpop.permute.xlu1 %429 }
  0x8c   :  { %v425_v0 = vpop.permute.xlu0 %424 }
  0x8f   :  { %v440_v4 = vpop.permute.xlu1 %439 }
  0x90   :  { %v435_v3 = vpop.permute.xlu0 %434 }
  0x93   :  { %v3390_v6 = vpop.permute.xlu1 %449 }
  0x94   :  { %v3386_v5 = vpop.permute.xlu0 %444 }
  0x97   :  { %v3394_v8 = vpop.permute.xlu1 %459 }
  0x98   :  { %v455_v7 = vpop.permute.xlu0 %454 }
  0x9b   :  { %v3409_v18 = vpop.permute.xlu1 %469 }
  0x9c   :  { %v3400_v12 = vpop.permute.xlu0 %464 }
  0x9f   :  { %v3422_v27 = vpop.permute.xlu1 %479 }
  0xa0   :  { %v3418_v23 = vpop.permute.xlu0 %474 }
  0xa3   :  { %v3440_v37 = vpop.permute.xlu1 %1366 }
  0xa4   :  { %v3435_v36 = vpop.permute.xlu0 %1361 }
  0xf5   :  { %v2553_v9 = vpop.f32.mrb[0].mxu0 }
  0xf6   :  { %v3398_v10 = vadd.f32 %v2553_v9, %v415_v59  ;;  %v259_v11 = vpop.f32.mrb[1].mxu0 }
  0xf7   :  { %v3402_v13 = vadd.f32 %v405_v58, %v259_v11  ;;  %v2554_v14 = vpop.f32.mrb[2].mxu0 }
  0xf8   :  { %v2335_v15 = vmul.f32 -1.442695, %v3398_v10  ;;  %v3406_v16 = vadd.f32 %v2554_v14, %v420_v63  ;;  %v262_v17 = vpop.f32.mrb[3].mxu0 }
  0xf9   :  { %v2333_v19 = vmul.f32 -1.442695, %v3402_v13  ;;  %v3412_v20 = vadd.f32 %v410_v61, %v262_v17 }
  0xfa   :  { %2772 = vpow2.f32 %v2335_v15  ;;  %v2336_v21 = vmul.f32 -1.442695, %v3406_v16 }
  0xfb   :  { %2774 = vpow2.f32 %v2333_v19  ;;  %v2334_v22 = vmul.f32 -1.442695, %v3412_v20 }
  0xfc   :  { %2776 = vpow2.f32 %v2336_v21 }
  0xfd   :  { %2778 = vpow2.f32 %v2334_v22  ;;  %v2557_v24 = vpop.f32.mrb[4].mxu0 }
  0xfe   :  { %v3420_v25 = vadd.f32 %v2557_v24, %v435_v3  ;;  %v275_v26 = vpop.f32.mrb[5].mxu0 }
  0xff   :  { %v3424_v28 = vadd.f32 %v425_v0, %v275_v26  ;;  %v2558_v29 = vpop.f32.mrb[6].mxu0  ;;  %v1372_v0 = vpop.permute.xlu0 %1371 }
 0x100   :  { %v2339_v30 = vmul.f32 -1.442695, %v3420_v25  ;;  %v3428_v31 = vadd.f32 %v2558_v29, %v440_v4  ;;  %v278_v32 = vpop.f32.mrb[7].mxu0  ;;  %v3458_v4 = vpop.permute.xlu1 %1376 }
 0x101   :  { %v2337_v33 = vmul.f32 -1.442695, %v3424_v28  ;;  %v3432_v34 = vadd.f32 %v430_v2, %v278_v32 }
 0x102   :  { %2780 = vpow2.f32 %v2339_v30  ;;  %v2340_v35 = vmul.f32 -1.442695, %v3428_v31 }
 0x103   :  { %2782 = vpow2.f32 %v2337_v33  ;;  %v2338_v39 = vmul.f32 -1.442695, %v3432_v34  ;;  %v3466_v19 = vpop.permute.xlu0 %1381 }
 0x104   :  { %v2773_v38 = vpop.eup %2772  ;;  %2784 = vpow2.f32 %v2340_v35  ;;  %v3477_v30 = vpop.permute.xlu1 %1386 }
 0x105   :  { %v2775_v42 = vpop.eup %2774  ;;  %v548_v45 = vadd.f32 1.0, %v2773_v38  ;;  %2786 = vpow2.f32 %v2338_v39  ;;  %v2561_v48 = vpop.f32.mrb[8].mxu0 }
 0x106   :  { %v2777_v51 = vpop.eup %2776  ;;  %v546_v54 = vadd.f32 1.0, %v2775_v42  ;;  %v3442_v55 = vadd.f32 %v2561_v48, %v455_v7  ;;  %v291_v56 = vpop.f32.mrb[9].mxu0 }
 0x107   :  { %v2779_v57 = vpop.eup %2778  ;;  %2788 = vrcp.f32 %v548_v45  ;;  %v549_v58 = vadd.f32 1.0, %v2777_v51  ;;  %v3445_v41 = vadd.f32 %v3386_v5, %v291_v56  ;;  %v2562_v59 = vpop.f32.mrb[10].mxu0 }
 0x108   :  { %2790 = vrcp.f32 %v546_v54  ;;  %v547_v40 = vadd.f32 1.0, %v2779_v57  ;;  %v2343_v61 = vmul.f32 -1.442695, %v3442_v55  ;;  %v3450_v62 = vadd.f32 %v2562_v59, %v3394_v8  ;;  %v294_v63 = vpop.f32.mrb[11].mxu0  ;;  %v1392_v42 = vpop.permute.xlu0 %1391 }
 0x109   :  { %2792 = vrcp.f32 %v549_v58  ;;  %v2341_v2 = vmul.f32 -1.442695, %v3445_v41  ;;  %v3455_v3 = vadd.f32 %v3390_v6, %v294_v63 }
 0x10a   :  { %2794 = vrcp.f32 %v547_v40  ;;  %v2344_v44 = vmul.f32 -1.442695, %v3450_v62 }
 0x10b   :  { %2796 = vpow2.f32 %v2343_v61  ;;  %v2342_v5 = vmul.f32 -1.442695, %v3455_v3 }
 0x10c   :  { %v2781_v7 = vpop.eup %2780  ;;  %2798 = vpow2.f32 %v2341_v2 }
 0x10d   :  { %v2783_v43 = vpop.eup %2782  ;;  %v552_v8 = vadd.f32 1.0, %v2781_v7  ;;  %2800 = vpow2.f32 %v2344_v44  ;;  %v2565_v9 = vpop.f32.mrb[12].mxu0 }
 0x10e   :  { %v2785_v6 = vpop.eup %2784  ;;  %v550_v11 = vadd.f32 1.0, %v2783_v43  ;;  %2802 = vpow2.f32 %v2342_v5  ;;  %v3464_v14 = vadd.f32 %v2565_v9, %v3418_v23  ;;  %v307_v15 = vpop.f32.mrb[13].mxu0 }
 0x10f   :  { %v2787_v17 = vpop.eup %2786  ;;  %2804 = vrcp.f32 %v552_v8  ;;  %v553_v47 = vadd.f32 1.0, %v2785_v6  ;;  %v3469_v21 = vadd.f32 %v3400_v12, %v307_v15  ;;  %v2566_v46 = vpop.f32.mrb[14].mxu0 }
 0x110   :  { %2806 = vrcp.f32 %v550_v11  ;;  %v551_v22 = vadd.f32 1.0, %v2787_v17  ;;  %v2347_v24 = vmul.f32 -1.442695, %v3464_v14  ;;  %v3474_v26 = vadd.f32 %v2566_v46, %v3422_v27  ;;  %v310_v23 = vpop.f32.mrb[15].mxu0  ;;  %v3505_v6 = vpop.permute.xlu0 %1401 }
 0x111   :  { %v2789_v29 = vpop.eup %2788  ;;  %2808 = vrcp.f32 %v553_v47  ;;  %v2345_v12 = vmul.f32 -1.442695, %v3469_v21  ;;  %v3481_v32 = vadd.f32 %v3409_v18, %v310_v23 }
 0x112   :  { %v2791_v50 = vpop.eup %2790  ;;  %2810 = vrcp.f32 %v551_v22  ;;  %v2348_v33 = vmul.f32 -1.442695, %v3474_v26  ;;  %v596_v39 = vmul.f32 %v2789_v29, %v3398_v10 }
 0x113   :  { %v2793_v35 = vpop.eup %2792  ;;  %2812 = vpow2.f32 %v2347_v24  ;;  %v2346_v27 = vmul.f32 -1.442695, %v3481_v32  ;;  %v594_v45 = vmul.f32 %v2791_v50, %v3402_v13 }
 0x114   :  { %v2795_v49 = vpop.eup %2794  ;;  %v597_v38 = vmul.f32 %v2793_v35, %v3406_v16  ;;  %2814 = vpow2.f32 %v2345_v12  ;;  %v1397_v16 = vpop.permute.xlu1 %1396 }
 0x115   :  { %v2797_v18 = vpop.eup %2796  ;;  %v595_v48 = vmul.f32 %v2795_v49, %v3412_v20  ;;  %2816 = vpow2.f32 %v2348_v33  ;;  %v2569_v51 = vpop.f32.mrb[16].mxu0 }
 0x116   :  { %v2799_v54 = vpop.eup %2798  ;;  %v556_v56 = vadd.f32 1.0, %v2797_v18  ;;  %2818 = vpow2.f32 %v2346_v27  ;;  %v3491_v53 = vadd.f32 %v2569_v51, %v1372_v0  ;;  %v323_v57 = vpop.f32.mrb[17].mxu0  ;;  %v627_v10 = vpack.c.bf16 %v597_v38, %v596_v39 }
 0x117   :  { %v2801_v58 = vpop.eup %2800  ;;  %v554_v59 = vadd.f32 1.0, %v2799_v54  ;;  %v3494_v52 = vadd.f32 %v3435_v36, %v323_v57  ;;  %v2570_v40 = vpop.f32.mrb[18].mxu0  ;;  %v626_v61 = vpack.c.bf16 %v595_v48, %v594_v45 }
 0x118   :  { %v2803_v13 = vpop.eup %2802  ;;  %2820 = vrcp.f32 %v556_v56  ;;  %v557_v20 = vadd.f32 1.0, %v2801_v58  ;;  %v2394_v63 = vmul.f32 -1.442695, %v3491_v53  ;;  %v3498_v2 = vadd.f32 %v2570_v40, %v3458_v4  ;;  %v326_v0 = vpop.f32.mrb[19].mxu0 }
 0x119   :  { %v2805_v44 = vpop.eup %2804  ;;  %2822 = vrcp.f32 %v554_v59  ;;  %v555_v5 = vadd.f32 1.0, %v2803_v13  ;;  %v2392_v7 = vmul.f32 -1.442695, %v3494_v52  ;;  %v3502_v43 = vadd.f32 %v3440_v37, %v326_v0  ;;  %2583 = vmatprep.subr.bf16.mxu1 %v626_v61  ;;  %v3510_v47 = vpop.permute.xlu1 %1406 }
 0x11a   :  { %v2807_v36 = vpop.eup %2806  ;;  %2824 = vrcp.f32 %v557_v20  ;;  %v2395_v8 = vmul.f32 -1.442695, %v3498_v2  ;;  %2584 = vmatpush3.bf16.msra.mxu1 %v626_v61  ;;  %v600_v15 = vmul.f32 %v2805_v44, %v3420_v25 }
 0x11b   :  { %v2809_v9 = vpop.eup %2808  ;;  %2826 = vrcp.f32 %v555_v5  ;;  %v2393_v4 = vmul.f32 -1.442695, %v3502_v43  ;;  %2585 = vmatprep.subr.bf16.mxu1 %v627_v10  ;;  %v598_v46 = vmul.f32 %v2807_v36, %v3424_v28 }
 0x11c   :  { %v2811_v11 = vpop.eup %2810  ;;  %v601_v17 = vmul.f32 %v2809_v9, %v3428_v31  ;;  %2828 = vpow2.f32 %v2394_v63 }
 0x11d   :  { %v2813_v37 = vpop.eup %2812  ;;  %v599_v22 = vmul.f32 %v2811_v11, %v3432_v34  ;;  %2830 = vpow2.f32 %v2392_v7  ;;  %v2573_v24 = vpop.f32.mrb[20].mxu0 }
 0x11e   :  { %v2815_v23 = vpop.eup %2814  ;;  %v560_v29 = vadd.f32 1.0, %v2813_v37  ;;  %2832 = vpow2.f32 %v2395_v8  ;;  %v3514_v12 = vadd.f32 %v2573_v24, %v1392_v42  ;;  %v339_v50 = vpop.f32.mrb[21].mxu0  ;;  %2586 = vmatpush3.bf16.msra.mxu1 %v627_v10  ;;  %v629_v25 = vpack.c.bf16 %v601_v17, %v600_v15 }
 0x11f   :  { %v2817_v33 = vpop.eup %2816  ;;  %v558_v31 = vadd.f32 1.0, %v2815_v23  ;;  %2834 = vpow2.f32 %v2393_v4  ;;  %v3517_v35 = vadd.f32 %v3466_v19, %v339_v50  ;;  %v2574_v27 = vpop.f32.mrb[22].mxu0  ;;  %v628_v28 = vpack.c.bf16 %v599_v22, %v598_v46 }
 0x120   :  { %v2819_v49 = vpop.eup %2818  ;;  %2836 = vrcp.f32 %v560_v29  ;;  %v561_v34 = vadd.f32 1.0, %v2817_v33  ;;  %v2398_v39 = vmul.f32 -1.442695, %v3514_v12  ;;  %v3520_v38 = vadd.f32 %v2574_v27, %v1397_v16  ;;  %v342_v18 = vpop.f32.mrb[23].mxu0 }
 0x121   :  { %v1412_v42 = vpop.permute.xlu0 %1411  ;;  %2838 = vrcp.f32 %v558_v31  ;;  %v559_v45 = vadd.f32 1.0, %v2819_v49  ;;  %v2396_v48 = vmul.f32 -1.442695, %v3517_v35  ;;  %v3524_v51 = vadd.f32 %v3477_v30, %v342_v18  ;;  %2587 = vmatprep.subr.bf16.mxu1 %v628_v28  ;;  %v1417_v57 = vpop.permute.xlu1 %1416 }
 0x122   :  { %v2821_v19 = vpop.eup %2820  ;;  %2840 = vrcp.f32 %v561_v34  ;;  %v2399_v54 = vmul.f32 -1.442695, %v3520_v38  ;;  %2588 = vmatpush3.bf16.msra.mxu1 %v628_v28 }
 0x123   :  { %v2823_v56 = vpop.eup %2822  ;;  %2842 = vrcp.f32 %v559_v45  ;;  %v2397_v10 = vmul.f32 -1.442695, %v3524_v51  ;;  %2589 = vmatprep.subr.bf16.mxu1 %v629_v25  ;;  %v604_v59 = vmul.f32 %v2821_v19, %v3442_v55 }
 0x124   :  { %v2825_v58 = vpop.eup %2824  ;;  %2844 = vpow2.f32 %v2398_v39  ;;  %v602_v13 = vmul.f32 %v2823_v56, %v3445_v41 }
 0x125   :  { %v2827_v16 = vpop.eup %2826  ;;  %v605_v30 = vmul.f32 %v2825_v58, %v3450_v62  ;;  %2846 = vpow2.f32 %v2396_v48  ;;  %v2577_v40 = vpop.f32.mrb[24].mxu0 }
 0x126   :  { %v2829_v61 = vpop.eup %2828  ;;  %v603_v20 = vmul.f32 %v2827_v16, %v3455_v3  ;;  %2848 = vpow2.f32 %v2399_v54  ;;  %v3532_v63 = vadd.f32 %v2577_v40, %v1412_v42  ;;  %v355_v0 = vpop.f32.mrb[25].mxu0  ;;  %2590 = vmatpush3.bf16.msra.mxu1 %v629_v25 }
 0x127   :  { %v2831_v44 = vpop.eup %2830  ;;  %v1422_v5 = vpop.permute.xlu0 %1421  ;;  %v1505_v7 = vadd.f32 1.0, %v2829_v61  ;;  %2850 = vpow2.f32 %v2397_v10  ;;  %v3535_v55 = vadd.f32 %v3505_v6, %v355_v0  ;;  %v631_v36 = vpack.c.bf16 %v605_v30, %v604_v59 }
 0x128   :  { %v2578_v62 = vpop.f32.mrb[26].mxu0  ;;  %v2833_v8 = vpop.eup %2832  ;;  %v1503_v9 = vadd.f32 1.0, %v2831_v44  ;;  %v630_v3 = vpack.c.bf16 %v603_v20, %v602_v13  ;;  %v2402_v37 = vmul.f32 -1.442695, %v3532_v63 }
 0x129   :  { %v3537_v4 = vadd.f32 %v2578_v62, %v1417_v57  ;;  %v358_v41 = vpop.f32.mrb[27].mxu0  ;;  %v2835_v11 = vpop.eup %2834  ;;  %2852 = vrcp.f32 %v1505_v7  ;;  %v1506_v17 = vadd.f32 1.0, %v2833_v8  ;;  %v2400_v24 = vmul.f32 -1.442695, %v3535_v55 }
 0x12a   :  { %v1427_v15 = vpop.permute.xlu1 %1426  ;;  %v3541_v46 = vadd.f32 %v3510_v47, %v358_v41  ;;  %v2837_v22 = vpop.eup %2836  ;;  %2854 = vrcp.f32 %v1503_v9  ;;  %v1504_v6 = vadd.f32 1.0, %v2835_v11  ;;  %2591 = vmatprep.subr.bf16.mxu1 %v630_v3 }
 0x12b   :  { %v2839_v23 = vpop.eup %2838  ;;  %2856 = vrcp.f32 %v1506_v17  ;;  %v2403_v29 = vmul.f32 -1.442695, %v3537_v4  ;;  %2592 = vmatpush3.bf16.msra.mxu1 %v630_v3  ;;  %v1432_v31 = vpop.permute.xlu0 %1431  ;;  %v608_v47 = vmul.f32 %v2837_v22, %v3464_v14  ;;  %v2754_v22 = vld [vmem:[%s4158_s2 + $0x10] sm:$0xff]  }
 0x12c   :  { %v2841_v50 = vpop.eup %2840  ;;  %2858 = vrcp.f32 %v1504_v6  ;;  %v2401_v25 = vmul.f32 -1.442695, %v3541_v46  ;;  %2593 = vmatprep.subr.bf16.mxu1 %v631_v36 }
 0x12d   :  { %v2843_v33 = vpop.eup %2842  ;;  %v609_v27 = vmul.f32 %v2841_v50, %v3474_v26  ;;  %2860 = vpow2.f32 %v2402_v37  ;;  %v2581_v28 = vpop.f32.mrb[28].mxu0  ;;  %v606_v26 = vmul.f32 %v2839_v23, %v3469_v21 }
 0x12e   :  { %v2845_v49 = vpop.eup %2844  ;;  %v607_v34 = vmul.f32 %v2843_v33, %v3481_v32  ;;  %2862 = vpow2.f32 %v2400_v24  ;;  %v3549_v39 = vadd.f32 %v2581_v28, %v1432_v31  ;;  %v371_v18 = vpop.f32.mrb[29].mxu0 }
 0x12f   :  { %v2847_v42 = vpop.eup %2846  ;;  %v1437_v45 = vpop.permute.xlu1 %1436  ;;  %v1509_v48 = vadd.f32 1.0, %v2845_v49  ;;  %2864 = vpow2.f32 %v2403_v29  ;;  %v3551_v19 = vadd.f32 %v1422_v5, %v371_v18  ;;  %2594 = vmatpush3.bf16.msra.mxu1 %v631_v36  ;;  %v633_v14 = vpack.c.bf16 %v609_v27, %v608_v47 }
 0x130   :  { %v2582_v54 = vpop.f32.mrb[30].mxu0  ;;  %v2849_v56 = vpop.eup %2848  ;;  %v1507_v57 = vadd.f32 1.0, %v2847_v42  ;;  %2866 = vpow2.f32 %v2401_v25  ;;  %v2406_v59 = vmul.f32 -1.442695, %v3549_v39  ;;  %v632_v13 = vpack.c.bf16 %v607_v34, %v606_v26  ;;  %v2755_v34 = vld [vmem:[%s4158_s2 + $0x18] sm:$0xff]  }
 0x131   :  { %v3554_v10 = vadd.f32 %v2582_v54, %v1437_v45  ;;  %v374_v32 = vpop.f32.mrb[31].mxu0  ;;  %v2851_v58 = vpop.eup %2850  ;;  %2868 = vrcp.f32 %v1509_v48  ;;  %v1510_v16 = vadd.f32 1.0, %v2849_v56  ;;  %v2404_v61 = vmul.f32 -1.442695, %v3551_v19 }
 0x132   :  { %v3557_v30 = vadd.f32 %v1427_v15, %v374_v32  ;;  %2870 = vrcp.f32 %v1507_v57  ;;  %v1508_v40 = vadd.f32 1.0, %v2851_v58  ;;  %2595 = vmatprep.subr.bf16.mxu1 %v632_v13  ;;  %v2753_v15 = vld [vmem:[%s4158_s2 + $0x8] sm:$0xff]  }
 0x133   :  { %v2853_v20 = vpop.eup %2852  ;;  %2872 = vrcp.f32 %v1510_v16  ;;  %v2407_v21 = vmul.f32 -1.442695, %v3554_v10  ;;  %2596 = vmatpush3.bf16.msra.mxu1 %v632_v13 }
 0x134   :  { %v2855_v0 = vpop.eup %2854  ;;  %2874 = vrcp.f32 %v1508_v40  ;;  %v2405_v44 = vmul.f32 -1.442695, %v3557_v30  ;;  %v1553_v62 = vmul.f32 %v2853_v20, %v3491_v53  ;;  %2597 = vmatprep.subr.bf16.mxu1 %v633_v14 }
 0x135   :  { %v2857_v5 = vpop.eup %2856  ;;  %2876 = vpow2.f32 %v2406_v59  ;;  %v1551_v9 = vmul.f32 %v2855_v0, %v3494_v52  ;;  %v2757_v59 = vld [vmem:[%s4158_s2 + $0x28] sm:$0xff]  }
 0x136   :  { %v2859_v7 = vpop.eup %2858  ;;  %v1554_v36 = vmul.f32 %v2857_v5, %v3498_v2  ;;  %2878 = vpow2.f32 %v2404_v61  ;;  %v2758_v61 = vld [vmem:[%s4158_s2 + $0x30] sm:$0xff]   ;;  %v2759_v5 = vld [vmem:[%s4158_s2 + $0x38] sm:$0xff]  }
 0x137   :  { %v2861_v8 = vpop.eup %2860  ;;  %v1552_v41 = vmul.f32 %v2859_v7, %v3502_v43  ;;  %2880 = vpow2.f32 %v2407_v21  ;;  %2598 = vmatpush3.bf16.msra.mxu1 %v633_v14 }
 0x138   :  { %v2863_v3 = vpop.eup %2862  ;;  %v1513_v11 = vadd.f32 1.0, %v2861_v8  ;;  %2882 = vpow2.f32 %v2405_v44  ;;  %v1585_v17 = vpack.c.bf16 %v1554_v36, %v1553_v62  ;;  %v2765_v36 = vld [vmem:[%s4158_s2 + $0x68] sm:$0xff]   ;;  %v2766_v8 = vld [vmem:[%s4158_s2 + $0x70] sm:$0xff]  }
 0x139   :  { %v2865_v37 = vpop.eup %2864  ;;  %v1511_v53 = vadd.f32 1.0, %v2863_v3  ;;  %v1584_v2 = vpack.c.bf16 %v1552_v41, %v1551_v9  ;;  %v2767_v9 = vld [vmem:[%s4158_s2 + $0x78] sm:$0xff]   ;;  %v2768_v41 = vld [vmem:[%s4159_s3] sm:$0xff]   ;;  %v640_v3 = vpop.permute.xlu1 %639 }
 0x13a   :  { %v2867_v52 = vpop.eup %2866  ;;  %2884 = vrcp.f32 %v1513_v11  ;;  %v1514_v43 = vadd.f32 1.0, %v2865_v37  ;;  %2600 = vmatmul.mubr.bf16.vlgmr.msra.gmra.mrb[0].mxu1 %v2753_v15  ;;  %v636_v11 = vpop.permute.xlu0 %635  ;;  %v3043_v37 = vmov 2  }
 0x13b   :  { %v2869_v6 = vpop.eup %2868  ;;  %2886 = vrcp.f32 %v1511_v53  ;;  %v1512_v24 = vadd.f32 1.0, %v2867_v52  ;;  %2635 = vmatprep.subr.bf16.mxu0 %v1584_v2  ;;  %2603 = vmatprep.mubr.bf16.mxu1 %v2754_v22  ;;  %v3626_v53 = vld [vmem:[%s4157_s4] sm:$0xff] }
 0x13c   :  { %v2871_v23 = vpop.eup %2870  ;;  %2888 = vrcp.f32 %v1514_v43  ;;  %2636 = vmatpush3.bf16.msra.mxu0 %v1584_v2  ;;  %v1557_v25 = vmul.f32 %v2869_v6, %v3514_v12  ;;  %v2756_v12 = vld [vmem:[%s4158_s2 + $0x20] sm:$0xff]   ;;  %2706 = vset.pattern.permute.xlu1 %v3043_v37  ;;  %v3632_v2 = vld [vmem:[%s4157_s4 + $0x8] sm:$0xff]  ;;  %v3640_v43 = vld [vmem:[%s4157_s4 + $0x10] sm:$0xff] }
 0x13d   :  { %v2873_v29 = vpop.eup %2872  ;;  %2890 = vrcp.f32 %v1512_v24  ;;  %2637 = vmatprep.subr.bf16.mxu0 %v1585_v17  ;;  %v1555_v47 = vmul.f32 %v2871_v23, %v3517_v35  ;;  %v644_v15 = vpop.permute.xlu1 %643  ;;  %2707 = vset.pattern.permute.xlu0 %v3043_v37  ;;  %v3646_v6 = vld [vmem:[%s4157_s4 + $0x88] sm:$0xff]  ;;  %v3652_v23 = vld [vmem:[%s4157_s4 + $0x18] sm:$0xff] }
 0x13e   :  { %v2875_v50 = vpop.eup %2874  ;;  %v1558_v33 = vmul.f32 %v2873_v29, %v3520_v38  ;;  %968 = vperm.xlu1 %2706, %v3626_v53   ;;  %972 = vperm.xlu0 %2707, %v3632_v2  }
 0x13f   :  { %v2877_v31 = vpop.eup %2876  ;;  %v1556_v27 = vmul.f32 %v2875_v50, %v3524_v51  ;;  %v3045_v50 = vmov 5  }
 0x140   :  { %v2879_v28 = vpop.eup %2878  ;;  %v1517_v49 = vadd.f32 1.0, %v2877_v31  ;;  %2638 = vmatpush3.bf16.msra.mxu0 %v1585_v17  ;;  %v1587_v18 = vpack.c.bf16 %v1558_v33, %v1557_v25  ;;  %v648_v17 = vpop.permute.xlu0 %647  ;;  %v3661_v25 = vld [vmem:[%s4160_s5] sm:$0x3] }
 0x141   :  { %v2881_v42 = vpop.eup %2880  ;;  %v1515_v45 = vadd.f32 1.0, %v2879_v28  ;;  %v1586_v48 = vpack.c.bf16 %v1556_v27, %v1555_v47  ;;  %v652_v22 = vpop.permute.xlu1 %651  ;;  %v3667_v33 = vld [vmem:[%s4157_s4 + $0x80] sm:$0xff] }
 0x142   :  { %v2883_v38 = vpop.eup %2882  ;;  %2892 = vrcp.f32 %v1517_v49  ;;  %v1518_v35 = vadd.f32 1.0, %v2881_v42  ;;  %2604 = vmatmul.mubr.bf16.gmra.mrb[4].mxu1 %v2755_v34  ;;  %976 = vperm.xlu1 %2706, %v3640_v43   ;;  %v3686_v49 = vld [vmem:[%s4157_s4 + $0x90] sm:$0xff] }
 0x143   :  { %2894 = vrcp.f32 %v1515_v45  ;;  %v1516_v51 = vadd.f32 1.0, %v2883_v38  ;;  %2639 = vmatprep.subr.bf16.mxu0 %v1586_v48  ;;  %2607 = vmatprep.mubr.bf16.mxu1 %v2756_v12 }
 0x144   :  { %v2885_v54 = vpop.eup %2884  ;;  %2896 = vrcp.f32 %v1518_v35  ;;  %2640 = vmatpush3.bf16.msra.mxu0 %v1586_v48  ;;  %v3635_v52 = vpop.permute.xlu0 %655  ;;  %1931 = vperm.xlu0 %2707, %v3646_v6  }
 0x145   :  { %v2887_v14 = vpop.eup %2886  ;;  %2898 = vrcp.f32 %v1516_v51  ;;  %2641 = vmatprep.subr.bf16.mxu0 %v1587_v18  ;;  %v1561_v57 = vmul.f32 %v2885_v54, %v3532_v63  ;;  %v660_v24 = vpop.permute.xlu1 %659  ;;  %v3703_v54 = vld [vmem:[%s4157_s4 + $0x98] sm:$0xff] }
 0x146   :  { %v2889_v56 = vpop.eup %2888  ;;  %v1559_v58 = vmul.f32 %v2887_v14, %v3535_v55  ;;  %980 = vperm.xlu1 %2706, %v3652_v23  }
 0x147   :  { %v2891_v26 = vpop.eup %2890  ;;  %v1562_v32 = vmul.f32 %v2889_v56, %v3537_v4 }
 0x148   :  { %v1560_v16 = vmul.f32 %v2891_v26, %v3541_v46  ;;  %2642 = vmatpush3.bf16.msra.mxu0 %v1587_v18  ;;  %1076 = vrot.lane.b32.xlu0 %v3626_v53, %s3044_s30  ;;  %v664_v29 = vpop.permute.xlu0 %663 }
 0x149   :  { %v1589_v40 = vpack.c.bf16 %v1562_v32, %v1561_v57  ;;  %2710 = vset.pattern.permute.xlu0 %v3045_v50  ;;  %v3671_v31 = vpop.permute.xlu1 %667 }
 0x14a   :  { %v1588_v13 = vpack.c.bf16 %v1560_v16, %v1559_v58  ;;  %2608 = vmatmul.mubr.bf16.gmra.mrb[8].mxu1 %v2757_v59  ;;  %2708 = vset.pattern.permute.xlu1 %v3042_v60 }
 0x14b   :  { %2611 = vmatprep.mubr.bf16.mxu1 %v2758_v61  ;;  %1055 = vperm.xlu1 %2708, %v3661_v25  }
 0x14c   :  { %v2893_v20 = vpop.eup %2892  ;;  %2643 = vmatprep.subr.bf16.mxu0 %v1588_v13  ;;  %2039 = vrot.lane.b32.xlu0 %v3667_v33, %s3044_s30  ;;  %v3674_v47 = vpop.permute.xlu0 %671 }
 0x14d   :  { %v2895_v63 = vpop.eup %2894  ;;  %2644 = vmatpush3.bf16.msra.mxu0 %v1588_v13  ;;  %v1565_v46 = vmul.f32 %v2893_v20, %v3549_v39  ;;  %v2761_v39 = vld [vmem:[%s4158_s2 + $0x48] sm:$0xff]   ;;  %v676_v27 = vpop.permute.xlu1 %675 }
 0x14e   :  { %v2897_v55 = vpop.eup %2896  ;;  %2645 = vmatprep.subr.bf16.mxu0 %v1589_v40  ;;  %v1563_v0 = vmul.f32 %v2895_v63, %v3551_v19  ;;  %v2762_v19 = vld [vmem:[%s4158_s2 + $0x50] sm:$0xff]  }
 0x14f   :  { %v2899_v4 = vpop.eup %2898  ;;  %v1566_v21 = vmul.f32 %v2897_v55, %v3554_v10  ;;  %v2763_v10 = vld [vmem:[%s4158_s2 + $0x58] sm:$0xff]   ;;  %2709 = vset.pattern.permute.xlu1 %v3043_v37 }
 0x150   :  { %v1564_v44 = vmul.f32 %v2899_v4, %v3557_v30  ;;  %v2764_v30 = vld [vmem:[%s4158_s2 + $0x60] sm:$0xff]   ;;  %1080 = vrot.lane.b32.xlu0 %v3640_v43, %s3044_s30  ;;  %1927 = vperm.xlu1 %2709, %v3667_v33   ;;  %v3681_v28 = vpop.permute.xlu0 %679 }
 0x151   :  { %2646 = vmatpush3.bf16.msra.mxu0 %v1589_v40  ;;  %v1591_v7 = vpack.c.bf16 %v1566_v21, %v1565_v46  ;;  %v3693_v45 = vpop.permute.xlu1 %683 }
 0x152   :  { %v1590_v62 = vpack.c.bf16 %v1564_v44, %v1563_v0  ;;  %2612 = vmatmul.mubr.bf16.gmra.mrb[12].mxu1 %v2759_v5 }
 0x153   :  { %2631 = vmatprep.mubr.bf16.mxu1 %v2768_v41 }
 0x154   :  { %2647 = vmatprep.subr.bf16.mxu0 %v1590_v62  ;;  %1082 = vrot.lane.b32.xlu0 %v3652_v23, %s3044_s30  ;;  %v3706_v14 = vpop.permute.xlu0 %687 }
 0x155   :  { %2648 = vmatpush3.bf16.msra.mxu0 %v1590_v62  ;;  %1935 = vperm.xlu1 %2709, %v3686_v49   ;;  %v3717_v58 = vpop.permute.xlu1 %691 }
 0x156   :  { %2649 = vmatprep.subr.bf16.mxu0 %v1591_v7 }
 0x158   :  { %1060 = vrot.lane.b32.xlu0 %v3626_v53, %s3046_s15  ;;  %v3723_v61 = vpop.permute.xlu0 %695 }
 0x159   :  { %2650 = vmatpush3.bf16.msra.mxu0 %v1591_v7  ;;  %1939 = vperm.xlu1 %2709, %v3703_v54   ;;  %v3738_v44 = vpop.permute.xlu1 %1593 }
 0x15c   :  { %2652 = vmatmul.mubr.bf16.vlgmr.msra.gmra.mrb[32].mxu0 %v2761_v39  ;;  %1064 = vrot.lane.b32.xlu0 %v3640_v43, %s3046_s15 }
 0x15d   :  { %2655 = vmatprep.mubr.bf16.mxu0 %v2762_v19  ;;  %1078 = vrot.lane.b32.xlu1 %v3632_v2, %s3044_s30  ;;  %v3743_v19 = vpop.permute.xlu0 %1597 }
 0x15e   :  { %2711 = vset.pattern.permute.xlu1 %v3045_v50 }
 0x160   :  { %1128 = vperm.xlu0 %2710, %v3626_v53  }
 0x161   :  { %2041 = vrot.lane.b32.xlu1 %v3646_v6, %s3044_s30 }
 0x164   :  { %2656 = vmatmul.mubr.bf16.gmra.mrb[36].mxu0 %v2763_v10  ;;  %1140 = vperm.xlu0 %2710, %v3652_v23  }
 0x165   :  { %2659 = vmatprep.mubr.bf16.mxu0 %v2764_v30  ;;  %2043 = vrot.lane.b32.xlu1 %v3686_v49, %s3044_s30 }
 0x168   :  { %2023 = vrot.lane.b32.xlu0 %v3667_v33, %s3046_s15 }
 0x169   :  { %2045 = vrot.lane.b32.xlu1 %v3703_v54, %s3044_s30 }
 0x16c   :  { %2660 = vmatmul.mubr.bf16.gmra.mrb[40].mxu0 %v2765_v36  ;;  %2027 = vrot.lane.b32.xlu0 %v3686_v49, %s3046_s15 }
 0x16d   :  { %2663 = vmatprep.mubr.bf16.mxu0 %v2766_v8  ;;  %1062 = vrot.lane.b32.xlu1 %v3632_v2, %s3046_s15 }
 0x170   :  { %1320 = vrot.lane.b32.xlu0 %v3626_v53, %s3047_s18 }
 0x171   :  { %1066 = vrot.lane.b32.xlu1 %v3652_v23, %s3046_s15 }
 0x174   :  { %2664 = vmatmul.mubr.bf16.gmra.mrb[44].mxu0 %v2767_v9  ;;  %2095 = vperm.xlu0 %2710, %v3646_v6  }
 0x175   :  { %1132 = vperm.xlu1 %2711, %v3632_v2  }
 0x179   :  { %1136 = vperm.xlu1 %2711, %v3640_v43  }
 0x20d   :  { %v2601_v34 = vpop.f32.mrb[0].mxu1 }
 0x20e   :  { %v3689_v18 = vadd.f32 %v2601_v34, %v644_v15  ;;  %v780_v42 = vpop.f32.mrb[1].mxu1  ;;  %v3765_v34 = vpop.permute.xlu0 %1605 }
 0x20f   :  { %v3695_v48 = vadd.f32 %v780_v42, %v636_v11  ;;  %v2602_v12 = vpop.f32.mrb[2].mxu1 }
 0x210   :  { %v2359_v38 = vmul.f32 -1.442695, %v3689_v18  ;;  %v3698_v35 = vadd.f32 %v2602_v12, %v648_v17  ;;  %v783_v51 = vpop.f32.mrb[3].mxu1 }
 0x211   :  { %v2357_v56 = vmul.f32 -1.442695, %v3695_v48  ;;  %v3709_v26 = vadd.f32 %v783_v51, %v640_v3 }
 0x212   :  { %2900 = vpow2.f32 %v2359_v38  ;;  %v2360_v57 = vmul.f32 -1.442695, %v3698_v35 }
 0x213   :  { %2902 = vpow2.f32 %v2357_v56  ;;  %v2358_v32 = vmul.f32 -1.442695, %v3709_v26 }
 0x214   :  { %2904 = vpow2.f32 %v2360_v57 }
 0x215   :  { %2906 = vpow2.f32 %v2358_v32  ;;  %v2605_v16 = vpop.f32.mrb[4].mxu1 }
 0x216   :  { %v3720_v59 = vadd.f32 %v2605_v16, %v660_v24  ;;  %v796_v40 = vpop.f32.mrb[5].mxu1  ;;  %v1602_v24 = vpop.permute.xlu1 %1601 }
 0x217   :  { %v3725_v13 = vadd.f32 %v796_v40, %v652_v22  ;;  %v2606_v20 = vpop.f32.mrb[6].mxu1 }
 0x218   :  { %v2363_v63 = vmul.f32 -1.442695, %v3720_v59  ;;  %v3728_v55 = vadd.f32 %v2606_v20, %v664_v29  ;;  %v799_v4 = vpop.f32.mrb[7].mxu1 }
 0x219   :  { %v2361_v46 = vmul.f32 -1.442695, %v3725_v13  ;;  %v3734_v21 = vadd.f32 %v799_v4, %v3635_v52 }
 0x21a   :  { %2908 = vpow2.f32 %v2363_v63  ;;  %v2364_v0 = vmul.f32 -1.442695, %v3728_v55  ;;  %v3775_v20 = vpop.permute.xlu1 %1609 }
 0x21b   :  { %2910 = vpow2.f32 %v2361_v46  ;;  %v2362_v5 = vmul.f32 -1.442695, %v3734_v21 }
 0x21c   :  { %v2901_v7 = vpop.eup %2900  ;;  %2912 = vpow2.f32 %v2364_v0 }
 0x21d   :  { %v2903_v62 = vpop.eup %2902  ;;  %v893_v39 = vadd.f32 1.0, %v2901_v7  ;;  %2914 = vpow2.f32 %v2362_v5  ;;  %v2609_v10 = vpop.f32.mrb[8].mxu1 }
 0x21e   :  { %v2905_v30 = vpop.eup %2904  ;;  %v891_v36 = vadd.f32 1.0, %v2903_v62  ;;  %v3745_v8 = vadd.f32 %v2609_v10, %v676_v27  ;;  %v812_v9 = vpop.f32.mrb[9].mxu1 }
 0x21f   :  { %v2907_v41 = vpop.eup %2906  ;;  %2916 = vrcp.f32 %v893_v39  ;;  %v894_v3 = vadd.f32 1.0, %v2905_v30  ;;  %v3750_v11 = vadd.f32 %v812_v9, %v3671_v31  ;;  %v2610_v15 = vpop.f32.mrb[10].mxu1 }
 0x220   :  { %2918 = vrcp.f32 %v891_v36  ;;  %v892_v17 = vadd.f32 1.0, %v2907_v41  ;;  %v2367_v37 = vmul.f32 -1.442695, %v3745_v8  ;;  %v3754_v22 = vadd.f32 %v2610_v15, %v3681_v28  ;;  %v815_v52 = vpop.f32.mrb[11].mxu1  ;;  %v3786_v62 = vpop.permute.xlu0 %1613 }
 0x221   :  { %2920 = vrcp.f32 %v894_v3  ;;  %v2365_v29 = vmul.f32 -1.442695, %v3750_v11  ;;  %v3760_v27 = vadd.f32 %v815_v52, %v3674_v47 }
 0x222   :  { %2922 = vrcp.f32 %v892_v17  ;;  %v2368_v31 = vmul.f32 -1.442695, %v3754_v22 }
 0x223   :  { %2924 = vpow2.f32 %v2367_v37  ;;  %v2366_v28 = vmul.f32 -1.442695, %v3760_v27  ;;  %v1618_v37 = vpop.permute.xlu1 %1617 }
 0x224   :  { %v2909_v42 = vpop.eup %2908  ;;  %2926 = vpow2.f32 %v2365_v29 }
 0x225   :  { %v2911_v12 = vpop.eup %2910  ;;  %v897_v38 = vadd.f32 1.0, %v2909_v42  ;;  %2928 = vpow2.f32 %v2368_v31  ;;  %v2613_v47 = vpop.f32.mrb[12].mxu1 }
 0x226   :  { %v2913_v51 = vpop.eup %2912  ;;  %v895_v56 = vadd.f32 1.0, %v2911_v12  ;;  %2930 = vpow2.f32 %v2366_v28  ;;  %v3771_v57 = vadd.f32 %v2613_v47, %v3717_v58  ;;  %v828_v32 = vpop.f32.mrb[13].mxu1 }
 0x227   :  { %v2915_v16 = vpop.eup %2914  ;;  %2932 = vrcp.f32 %v897_v38  ;;  %v898_v40 = vadd.f32 1.0, %v2913_v51  ;;  %v3778_v63 = vadd.f32 %v828_v32, %v3693_v45  ;;  %v2614_v4 = vpop.f32.mrb[14].mxu1 }
 0x228   :  { %2934 = vrcp.f32 %v895_v56  ;;  %v896_v46 = vadd.f32 1.0, %v2915_v16  ;;  %v2371_v0 = vmul.f32 -1.442695, %v3771_v57  ;;  %v3782_v58 = vadd.f32 %v2614_v4, %v3723_v61  ;;  %v831_v5 = vpop.f32.mrb[15].mxu1  ;;  %v1622_v38 = vpop.permute.xlu0 %1621 }
 0x229   :  { %v2917_v7 = vpop.eup %2916  ;;  %2936 = vrcp.f32 %v898_v40  ;;  %v2369_v39 = vmul.f32 -1.442695, %v3778_v63  ;;  %v3790_v45 = vadd.f32 %v831_v5, %v3706_v14 }
 0x22a   :  { %v2919_v10 = vpop.eup %2918  ;;  %2938 = vrcp.f32 %v896_v46  ;;  %v2372_v30 = vmul.f32 -1.442695, %v3782_v58  ;;  %v941_v41 = vmul.f32 %v2917_v7, %v3689_v18 }
 0x22b   :  { %v2921_v61 = vpop.eup %2920  ;;  %2940 = vpow2.f32 %v2371_v0  ;;  %v2370_v36 = vmul.f32 -1.442695, %v3790_v45  ;;  %v939_v15 = vmul.f32 %v2919_v10, %v3695_v48 }
 0x22c   :  { %v2923_v9 = vpop.eup %2922  ;;  %v942_v3 = vmul.f32 %v2921_v61, %v3698_v35  ;;  %2942 = vpow2.f32 %v2369_v39 }
 0x22d   :  { %v2925_v14 = vpop.eup %2924  ;;  %v940_v17 = vmul.f32 %v2923_v9, %v3709_v26  ;;  %2944 = vpow2.f32 %v2372_v30 }
 0x22e   :  { %v2927_v29 = vpop.eup %2926  ;;  %v901_v31 = vadd.f32 1.0, %v2925_v14  ;;  %2946 = vpow2.f32 %v2370_v36  ;;  %v960_v18 = vpack.c.bf16 %v942_v3, %v941_v41  ;;  %v3823_v3 = vpop.permute.xlu0 %1629 }
 0x22f   :  { %v2653_v52 = vpop.f32.mrb[32].mxu0  ;;  %v2929_v12 = vpop.eup %2928  ;;  %v899_v35 = vadd.f32 1.0, %v2927_v29  ;;  %v959_v48 = vpack.c.bf16 %v940_v17, %v939_v15 }
 0x230   :  { %v3800_v28 = vadd.f32 %v2653_v52, %v1602_v24  ;;  %v1738_v42 = vpop.f32.mrb[33].mxu0  ;;  %v2931_v56 = vpop.eup %2930  ;;  %2948 = vrcp.f32 %v901_v31  ;;  %v902_v26 = vadd.f32 1.0, %v2929_v12 }
 0x231   :  { %v3803_v47 = vadd.f32 %v1738_v42, %v3738_v44  ;;  %v2654_v51 = vpop.f32.mrb[34].mxu0  ;;  %v2933_v40 = vpop.eup %2932  ;;  %2950 = vrcp.f32 %v899_v35  ;;  %v900_v4 = vadd.f32 1.0, %v2931_v56  ;;  %2615 = vmatprep.subr.bf16.mxu1 %v959_v48 }
 0x232   :  { %v2434_v32 = vmul.f32 -1.442695, %v3800_v28  ;;  %v3807_v16 = vadd.f32 %v2654_v51, %v3765_v34  ;;  %v1741_v24 = vpop.f32.mrb[35].mxu0  ;;  %v2935_v0 = vpop.eup %2934  ;;  %2952 = vrcp.f32 %v902_v26  ;;  %2616 = vmatpush3.bf16.msra.mxu1 %v959_v48  ;;  %v945_v30 = vmul.f32 %v2933_v40, %v3720_v59 }
 0x233   :  { %v2432_v46 = vmul.f32 -1.442695, %v3803_v47  ;;  %v3812_v44 = vadd.f32 %v1741_v24, %v3743_v19  ;;  %v2937_v7 = vpop.eup %2936  ;;  %2954 = vrcp.f32 %v900_v4  ;;  %v3815_v34 = vpop.permute.xlu1 %1625  ;;  %2617 = vmatprep.subr.bf16.mxu1 %v960_v18  ;;  %v3048_v19 = vmov 6  }
 0x234   :  { %v2435_v5 = vmul.f32 -1.442695, %v3807_v16  ;;  %v2939_v10 = vpop.eup %2938  ;;  %v946_v61 = vmul.f32 %v2937_v7, %v3728_v55  ;;  %2956 = vpow2.f32 %v2434_v32  ;;  %2712 = vset.pattern.permute.xlu1 %v3048_v19  ;;  %v943_v9 = vmul.f32 %v2935_v0, %v3725_v13  ;;  %v1638_v24 = vpop.permute.xlu0 %1637 }
 0x235   :  { %v2433_v39 = vmul.f32 -1.442695, %v3812_v44  ;;  %v2941_v36 = vpop.eup %2940  ;;  %v944_v41 = vmul.f32 %v2939_v10, %v3734_v21  ;;  %2958 = vpow2.f32 %v2432_v46  ;;  %1185 = vperm.xlu1 %2712, %v3626_v53  }
 0x236   :  { %v2943_v15 = vpop.eup %2942  ;;  %v905_v17 = vadd.f32 1.0, %v2941_v36  ;;  %2960 = vpow2.f32 %v2435_v5  ;;  %2618 = vmatpush3.bf16.msra.mxu1 %v960_v18  ;;  %v962_v52 = vpack.c.bf16 %v946_v61, %v945_v30 }
 0x237   :  { %v2657_v14 = vpop.f32.mrb[36].mxu0  ;;  %v2945_v29 = vpop.eup %2944  ;;  %v903_v31 = vadd.f32 1.0, %v2943_v15  ;;  %2962 = vpow2.f32 %v2433_v39  ;;  %v961_v42 = vpack.c.bf16 %v944_v41, %v943_v9 }
 0x238   :  { %v3826_v59 = vadd.f32 %v2657_v14, %v1618_v37  ;;  %v1754_v55 = vpop.f32.mrb[37].mxu0  ;;  %v2947_v12 = vpop.eup %2946  ;;  %2964 = vrcp.f32 %v905_v17  ;;  %v906_v35 = vadd.f32 1.0, %v2945_v29 }
 0x239   :  { %v3829_v13 = vadd.f32 %v1754_v55, %v3775_v20  ;;  %v2658_v21 = vpop.f32.mrb[38].mxu0  ;;  %2966 = vrcp.f32 %v903_v31  ;;  %v904_v18 = vadd.f32 1.0, %v2947_v12  ;;  %v1634_v48 = vpop.permute.xlu1 %1633  ;;  %2619 = vmatprep.subr.bf16.mxu1 %v961_v42  ;;  %2025 = vrot.lane.b32.xlu1 %v3646_v6, %s3046_s15 }
 0x23a   :  { %v2438_v53 = vmul.f32 -1.442695, %v3826_v59  ;;  %v3832_v51 = vadd.f32 %v2658_v21, %v1622_v38  ;;  %v1757_v37 = vpop.f32.mrb[39].mxu0  ;;  %v2949_v20 = vpop.eup %2948  ;;  %2968 = vrcp.f32 %v906_v35  ;;  %2620 = vmatpush3.bf16.msra.mxu1 %v961_v42 }
 0x23b   :  { %v2436_v56 = vmul.f32 -1.442695, %v3829_v13  ;;  %v3836_v26 = vadd.f32 %v1757_v37, %v3786_v62  ;;  %v2951_v38 = vpop.eup %2950  ;;  %2970 = vrcp.f32 %v904_v18  ;;  %2621 = vmatprep.subr.bf16.mxu1 %v962_v52  ;;  %v949_v62 = vmul.f32 %v2949_v20, %v3745_v8  ;;  %v1646_v31 = vpop.permute.xlu0 %1645 }
 0x23c   :  { %v2439_v32 = vmul.f32 -1.442695, %v3832_v51  ;;  %v2953_v4 = vpop.eup %2952  ;;  %2972 = vpow2.f32 %v2438_v53  ;;  %v947_v39 = vmul.f32 %v2951_v38, %v3750_v11 }
 0x23d   :  { %v2437_v40 = vmul.f32 -1.442695, %v3836_v26  ;;  %v2955_v46 = vpop.eup %2954  ;;  %v950_v0 = vmul.f32 %v2953_v4, %v3754_v22  ;;  %2974 = vpow2.f32 %v2436_v56  ;;  %2029 = vrot.lane.b32.xlu1 %v3703_v54, %s3046_s15  ;;  %v1642_v9 = vpop.permute.xlu1 %1641 }
 0x23e   :  { %v2957_v7 = vpop.eup %2956  ;;  %v948_v10 = vmul.f32 %v2955_v46, %v3760_v27  ;;  %2976 = vpow2.f32 %v2439_v32  ;;  %2622 = vmatpush3.bf16.msra.mxu1 %v962_v52 }
 0x23f   :  { %v2661_v5 = vpop.f32.mrb[40].mxu0  ;;  %v2959_v36 = vpop.eup %2958  ;;  %v1851_v8 = vadd.f32 1.0, %v2957_v7  ;;  %2978 = vpow2.f32 %v2437_v40  ;;  %v964_v14 = vpack.c.bf16 %v950_v0, %v949_v62 }
 0x240   :  { %v3848_v30 = vadd.f32 %v2661_v5, %v1634_v48  ;;  %v1770_v61 = vpop.f32.mrb[41].mxu0  ;;  %v2961_v15 = vpop.eup %2960  ;;  %v1849_v17 = vadd.f32 1.0, %v2959_v36  ;;  %v963_v27 = vpack.c.bf16 %v948_v10, %v947_v39 }
 0x241   :  { %v3851_v22 = vadd.f32 %v1770_v61, %v3815_v34  ;;  %v2662_v41 = vpop.f32.mrb[42].mxu0  ;;  %v2963_v29 = vpop.eup %2962  ;;  %2980 = vrcp.f32 %v1851_v8  ;;  %v1852_v52 = vadd.f32 1.0, %v2961_v15  ;;  %1193 = vperm.xlu1 %2712, %v3640_v43  }
 0x242   :  { %v3853_v55 = vadd.f32 %v2662_v41, %v1638_v24  ;;  %v1773_v11 = vpop.f32.mrb[43].mxu0  ;;  %v2442_v21 = vmul.f32 -1.442695, %v3848_v30  ;;  %v2965_v34 = vpop.eup %2964  ;;  %2982 = vrcp.f32 %v1849_v17  ;;  %v1850_v12 = vadd.f32 1.0, %v2963_v29  ;;  %2623 = vmatprep.subr.bf16.mxu1 %v963_v27  ;;  %v3884_v17 = vld [vmem:[%s4160_s5 + $0x2] sm:$0x3] }
 0x243   :  { %v3857_v42 = vadd.f32 %v1773_v11, %v3823_v3  ;;  %v2440_v35 = vmul.f32 -1.442695, %v3851_v22  ;;  %v2967_v53 = vpop.eup %2966  ;;  %2984 = vrcp.f32 %v1852_v52  ;;  %2624 = vmatpush3.bf16.msra.mxu1 %v963_v27  ;;  %v953_v56 = vmul.f32 %v2965_v34, %v3771_v57  ;;  %v1650_v32 = vpop.permute.xlu1 %1649 }
 0x244   :  { %v2443_v37 = vmul.f32 -1.442695, %v3853_v55  ;;  %v2969_v18 = vpop.eup %2968  ;;  %2986 = vrcp.f32 %v1850_v12  ;;  %2625 = vmatprep.subr.bf16.mxu1 %v964_v14  ;;  %v1654_v0 = vpop.permute.xlu0 %1653  ;;  %v951_v10 = vmul.f32 %v2967_v53, %v3778_v63 }
 0x245   :  { %v2441_v48 = vmul.f32 -1.442695, %v3857_v42  ;;  %v2971_v3 = vpop.eup %2970  ;;  %v954_v20 = vmul.f32 %v2969_v18, %v3782_v58  ;;  %2988 = vpow2.f32 %v2442_v21  ;;  %1197 = vperm.xlu1 %2712, %v3652_v23  }
 0x246   :  { %v2973_v24 = vpop.eup %2972  ;;  %v952_v40 = vmul.f32 %v2971_v3, %v3790_v45  ;;  %2990 = vpow2.f32 %v2440_v35 }
 0x247   :  { %v2665_v38 = vpop.f32.mrb[44].mxu0  ;;  %v2975_v62 = vpop.eup %2974  ;;  %v1855_v5 = vadd.f32 1.0, %v2973_v24  ;;  %2992 = vpow2.f32 %v2443_v37  ;;  %2626 = vmatpush3.bf16.msra.mxu1 %v964_v14  ;;  %v966_v7 = vpack.c.bf16 %v954_v20, %v953_v56  ;;  %v2770_v20 = vld [vmem:[%s4159_s3 + $0x10] sm:$0xff]  }
 0x248   :  { %v3867_v4 = vadd.f32 %v2665_v38, %v1650_v32  ;;  %v1786_v46 = vpop.f32.mrb[45].mxu0  ;;  %v2977_v39 = vpop.eup %2976  ;;  %v1853_v23 = vadd.f32 1.0, %v2975_v62  ;;  %2994 = vpow2.f32 %v2441_v48  ;;  %v965_v63 = vpack.c.bf16 %v952_v40, %v951_v10  ;;  %v2769_v48 = vld [vmem:[%s4159_s3 + $0x8] sm:$0xff]  }
 0x249   :  { %v3869_v57 = vadd.f32 %v1786_v46, %v1642_v9  ;;  %v2666_v58 = vpop.f32.mrb[46].mxu0  ;;  %v2979_v36 = vpop.eup %2978  ;;  %2996 = vrcp.f32 %v1855_v5  ;;  %v1856_v8 = vadd.f32 1.0, %v2977_v39  ;;  %2283 = vrot.lane.b32.xlu1 %v3667_v33, %s3047_s18 }
 0x24a   :  { %v3872_v61 = vadd.f32 %v2666_v58, %v1654_v0  ;;  %v1789_v45 = vpop.f32.mrb[47].mxu0  ;;  %v2446_v41 = vmul.f32 -1.442695, %v3867_v4  ;;  %2998 = vrcp.f32 %v1853_v23  ;;  %v1854_v9 = vadd.f32 1.0, %v2979_v36  ;;  %2713 = vset.pattern.permute.xlu1 %v3042_v60  ;;  %2627 = vmatprep.subr.bf16.mxu1 %v965_v63 }
 0x24b   :  { %v3875_v15 = vadd.f32 %v1789_v45, %v1646_v31  ;;  %v2444_v14 = vmul.f32 -1.442695, %v3869_v57  ;;  %v2981_v11 = vpop.eup %2980  ;;  %3000 = vrcp.f32 %v1856_v8  ;;  %2628 = vmatpush3.bf16.msra.mxu1 %v965_v63 }
 0x24c   :  { %v2447_v27 = vmul.f32 -1.442695, %v3872_v61  ;;  %v2983_v29 = vpop.eup %2982  ;;  %3002 = vrcp.f32 %v1854_v9  ;;  %v1899_v21 = vmul.f32 %v2981_v11, %v3800_v28  ;;  %2629 = vmatprep.subr.bf16.mxu1 %v966_v7 }
 0x24d   :  { %v2445_v31 = vmul.f32 -1.442695, %v3875_v15  ;;  %v2985_v52 = vpop.eup %2984  ;;  %3004 = vpow2.f32 %v2446_v41  ;;  %2018 = vperm.xlu1 %2713, %v3884_v17   ;;  %v1897_v35 = vmul.f32 %v2983_v29, %v3803_v47 }
 0x24e   :  { %v2987_v60 = vpop.eup %2986  ;;  %v1900_v34 = vmul.f32 %v2985_v52, %v3807_v16  ;;  %3006 = vpow2.f32 %v2444_v14 }
 0x24f   :  { %v2989_v12 = vpop.eup %2988  ;;  %v1898_v53 = vmul.f32 %v2987_v60, %v3812_v44  ;;  %3008 = vpow2.f32 %v2447_v27  ;;  %2630 = vmatpush3.bf16.msra.mxu1 %v966_v7 }
 0x250   :  { %v2991_v37 = vpop.eup %2990  ;;  %v1859_v18 = vadd.f32 1.0, %v2989_v12  ;;  %3010 = vpow2.f32 %v2445_v31  ;;  %v1919_v3 = vpack.c.bf16 %v1900_v34, %v1899_v21 }
 0x251   :  { %v2993_v56 = vpop.eup %2992  ;;  %v1857_v28 = vadd.f32 1.0, %v2991_v37  ;;  %v1918_v16 = vpack.c.bf16 %v1898_v53, %v1897_v35  ;;  %2714 = vset.pattern.permute.xlu1 %v3045_v50  ;;  %v2771_v37 = vld [vmem:[%s4159_s3 + $0x18] sm:$0xff]   ;;  %s3049_s3 = smov 127  }
 0x252   :  { %v2995_v47 = vpop.eup %2994  ;;  %3012 = vrcp.f32 %v1859_v18  ;;  %v1860_v44 = vadd.f32 1.0, %v2993_v56  ;;  %2091 = vperm.xlu1 %2714, %v3667_v33   ;;  %2632 = vmatmul.mubr.bf16.vlgmr.msra.gmra.mrb[16].mxu1 %v2769_v48  ;;  %v969_v18 = vpop.permute.xlu1 %968 }
 0x253   :  { %v2997_v32 = vpop.eup %2996  ;;  %3014 = vrcp.f32 %v1857_v28  ;;  %v1858_v38 = vadd.f32 1.0, %v2995_v47  ;;  %2667 = vmatprep.subr.bf16.mxu1 %v1918_v16  ;;  %2683 = vmatprep.mubr.bf16.mxu1 %v2770_v20 }
 0x254   :  { %v2999_v24 = vpop.eup %2998  ;;  %3016 = vrcp.f32 %v1860_v44  ;;  %2668 = vmatpush3.bf16.msra.mxu1 %v1918_v16  ;;  %v1903_v62 = vmul.f32 %v2997_v32, %v3826_v59 }
 0x255   :  { %v3001_v40 = vpop.eup %3000  ;;  %3018 = vrcp.f32 %v1858_v38  ;;  %2669 = vmatprep.subr.bf16.mxu1 %v1919_v3  ;;  %v1901_v58 = vmul.f32 %v2999_v24, %v3829_v13 }
 0x256   :  { %v3003_v46 = vpop.eup %3002  ;;  %v1904_v0 = vmul.f32 %v3001_v40, %v3832_v51  ;;  %2715 = vset.pattern.permute.xlu1 %v3041_v1 }
 0x257   :  { %v3005_v5 = vpop.eup %3004  ;;  %v1902_v7 = vmul.f32 %v3003_v46, %v3836_v26 }
 0x258   :  { %v3007_v39 = vpop.eup %3006  ;;  %v1863_v10 = vadd.f32 1.0, %v3005_v5  ;;  %v1921_v23 = vpack.c.bf16 %v1904_v0, %v1903_v62  ;;  %2670 = vmatpush3.bf16.msra.mxu1 %v1919_v3 }
 0x259   :  { %v3009_v45 = vpop.eup %3008  ;;  %v1861_v36 = vadd.f32 1.0, %v3007_v39  ;;  %v1920_v8 = vpack.c.bf16 %v1902_v7, %v1901_v58 }
 0x25a   :  { %v3011_v41 = vpop.eup %3010  ;;  %3020 = vrcp.f32 %v1863_v10  ;;  %v1864_v59 = vadd.f32 1.0, %v3009_v45 }
 0x25b   :  { %3022 = vrcp.f32 %v1861_v36  ;;  %v1862_v51 = vadd.f32 1.0, %v3011_v41  ;;  %2671 = vmatprep.subr.bf16.mxu1 %v1920_v8 }
 0x25c   :  { %v3013_v9 = vpop.eup %3012  ;;  %3024 = vrcp.f32 %v1864_v59  ;;  %2672 = vmatpush3.bf16.msra.mxu1 %v1920_v8 }
 0x25d   :  { %v3015_v14 = vpop.eup %3014  ;;  %3026 = vrcp.f32 %v1862_v51  ;;  %2673 = vmatprep.subr.bf16.mxu1 %v1921_v23  ;;  %v1907_v63 = vmul.f32 %v3013_v9, %v3848_v30 }
 0x25e   :  { %v3017_v13 = vpop.eup %3016  ;;  %v1905_v27 = vmul.f32 %v3015_v14, %v3851_v22 }
 0x25f   :  { %v3019_v26 = vpop.eup %3018  ;;  %v1908_v11 = vmul.f32 %v3017_v13, %v3853_v55 }
 0x260   :  { %v1906_v29 = vmul.f32 %v3019_v26, %v3857_v42  ;;  %2674 = vmatpush3.bf16.msra.mxu1 %v1921_v23 }
 0x261   :  { %v1923_v31 = vpack.c.bf16 %v1908_v11, %v1907_v63 }
 0x262   :  { %v1922_v52 = vpack.c.bf16 %v1906_v29, %v1905_v27 }
 0x264   :  { %v3021_v60 = vpop.eup %3020  ;;  %2675 = vmatprep.subr.bf16.mxu1 %v1922_v52 }
 0x265   :  { %v3023_v21 = vpop.eup %3022  ;;  %2676 = vmatpush3.bf16.msra.mxu1 %v1922_v52  ;;  %v1911_v35 = vmul.f32 %v3021_v60, %v3867_v4  ;;  %v977_v4 = vpop.permute.xlu1 %976 }
 0x266   :  { %v3025_v34 = vpop.eup %3024  ;;  %2677 = vmatprep.subr.bf16.mxu1 %v1923_v31  ;;  %v1909_v55 = vmul.f32 %v3023_v21, %v3869_v57 }
 0x267   :  { %v3027_v12 = vpop.eup %3026  ;;  %v1912_v30 = vmul.f32 %v3025_v34, %v3872_v61  ;;  %v973_v61 = vpop.permute.xlu0 %972 }
 0x268   :  { %v1910_v22 = vmul.f32 %v3027_v12, %v3875_v15 }
 0x269   :  { %2678 = vmatpush3.bf16.msra.mxu1 %v1923_v31  ;;  %v1925_v42 = vpack.c.bf16 %v1912_v30, %v1911_v35  ;;  %v981_v48 = vpop.permute.xlu1 %980 }
 0x26a   :  { %v1924_v53 = vpack.c.bf16 %v1910_v22, %v1909_v55 }
 0x26b   :  { %v3919_v57 = vpop.permute.xlu0 %1931 }
 0x26c   :  { %2679 = vmatprep.subr.bf16.mxu1 %v1924_v53 }
 0x26d   :  { %2680 = vmatpush3.bf16.msra.mxu1 %v1924_v53  ;;  %v3917_v3 = vpop.permute.xlu1 %1055 }
 0x26e   :  { %2681 = vmatprep.subr.bf16.mxu1 %v1925_v42 }
 0x26f   :  { %v1077_v56 = vpop.permute.xlu0 %1076 }
 0x271   :  { %2682 = vmatpush3.bf16.msra.mxu1 %v1925_v42  ;;  %v1928_v15 = vpop.permute.xlu1 %1927 }
 0x273   :  { %v2040_v16 = vpop.permute.xlu0 %2039 }
 0x274   :  { %2684 = vmatmul.mubr.bf16.vlgmr.msra.gmra.mrb[20].mxu1 %v2771_v37 }
 0x275   :  { %v1936_v28 = vpop.permute.xlu1 %1935 }
 0x277   :  { %v1081_v47 = vpop.permute.xlu0 %1080 }
 0x279   :  { %v1940_v20 = vpop.permute.xlu1 %1939 }
 0x27b   :  { %v1083_v32 = vpop.permute.xlu0 %1082 }
 0x27d   :  { %v1079_v44 = vpop.permute.xlu1 %1078 }
 0x27f   :  { %v3921_v24 = vpop.permute.xlu0 %1060 }
 0x281   :  { %v2042_v38 = vpop.permute.xlu1 %2041 }
 0x283   :  { %v1065_v46 = vpop.permute.xlu0 %1064 }
 0x285   :  { %v2044_v40 = vpop.permute.xlu1 %2043 }
 0x287   :  { %v3923_v0 = vpop.permute.xlu0 %1128 }
 0x289   :  { %v2046_v62 = vpop.permute.xlu1 %2045 }
 0x28b   :  { %v3925_v58 = vpop.permute.xlu0 %1140 }
 0x28d   :  { %v1063_v5 = vpop.permute.xlu1 %1062 }
 0x28f   :  { %v3929_v39 = vpop.permute.xlu0 %2023 }
 0x291   :  { %v3927_v7 = vpop.permute.xlu1 %1066 }
 0x293   :  { %v3933_v23 = vpop.permute.xlu0 %2027 }
 0x295   :  { %v3931_v10 = vpop.permute.xlu1 %1132 }
 0x297   :  { %v1321_v36 = vpop.permute.xlu0 %1320 }
 0x298   :  { %2687 = vpush %v1321_v36 }
 0x299   :  { %v3935_v45 = vpop.permute.xlu1 %1136 }
 0x2b4   :  { %v3937_v8 = vpop.permute.xlu1 %1185 }
 0x2b8   :  { %v3939_v41 = vpop.permute.xlu1 %2025 }
 0x2bc   :  { %v3941_v59 = vpop.permute.xlu1 %2029 }
 0x2c0   :  { %v3943_v51 = vpop.permute.xlu1 %1193 }
 0x2c4   :  { %v3945_v9 = vpop.permute.xlu1 %1197 }
 0x2c8   :  { %v2284_v14 = vpop.permute.xlu1 %2283 }
 0x2c9   :  { %2689 = vpush %v2284_v14  ;;  %v3051_v14 = vmov 1966171168  }
 0x325   :  { %v2633_v13 = vpop.f32.mrb[16].mxu1 }
 0x326   :  { %v1038_v26 = vadd.f32 %v2633_v13, %v977_v4  ;;  %v1029_v63 = vpop.f32.mrb[17].mxu1  ;;  %v1114_v13 = vunpack.c.l.s4 %v3051_v14 }
 0x327   :  { %v2634_v11 = vpop.f32.mrb[18].mxu1  ;;  %v1030_v31 = vadd.f32 %v1029_v63, %v969_v18 }
 0x328   :  { %v1090_v27 = vadd.f32 %v1081_v47, %v1038_v26  ;;  %v1074_v29 = vadd.f32 %v1065_v46, %v1038_v26  ;;  %v1041_v52 = vadd.f32 %v2634_v11, %v981_v48  ;;  %v1032_v60 = vpop.f32.mrb[19].mxu1  ;;  %v1116_v26 = vlaneseq }
 0x329   :  { %v1088_v21 = vadd.f32 %v1077_v56, %v1030_v31  ;;  %v1033_v12 = vadd.f32 %v1032_v60, %v973_v61 }
 0x32a   :  { %1100 = vrot.lane.b32.xlu0 %v1090_v27, %s3049_s3  ;;  %1238 = vperm.xlu1 %2715, %v1074_v29   ;;  %v1091_v34 = vadd.f32 %v1083_v32, %v1041_v52  ;;  %v1115_v27 = vunpack.c.0.s8 %v1114_v13  ;;  %v1117_v29 = vshrl.u32 %v1116_v26, 7 }
 0x32b   :  { %v1089_v35 = vadd.f32 %v1079_v44, %v1033_v12  ;;  %v1073_v30 = vadd.f32 %v1063_v5, %v1033_v12  ;;  %v4022_v12 = vld [vmem:[%s4162_s8] sm:$0x3] }
 0x32e   :  { %1096 = vrot.lane.b32.xlu0 %v1088_v21, %s3049_s3  ;;  %1102 = vrot.lane.b32.xlu1 %v1091_v34, %s3049_s3  ;;  %v4015_v21 = vsub.s32 %v1115_v27, %v1117_v29 }
 0x332   :  { %1098 = vrot.lane.b32.xlu1 %v1089_v35, %s3049_s3  ;;  %v1045_v35 = vld [vmem:[%s4163_s7] sm:$0x3] }
 0x336   :  { %1233 = vperm.xlu1 %2715, %v1073_v30  }
 0x33a   :  { %2716 = vset.pattern.permute.xlu1 %v3048_v19 }
 0x347   :  { %v2685_v55 = vpop.f32.mrb[20].mxu1 }
 0x348   :  { %v1997_v22 = vadd.f32 %v2685_v55, %v1936_v28  ;;  %v1988_v42 = vpop.f32.mrb[21].mxu1 }
 0x349   :  { %v1989_v53 = vadd.f32 %v1988_v42, %v1928_v15  ;;  %v2686_v37 = vpop.f32.mrb[22].mxu1  ;;  %v3050_v15 = vmov 4  }
 0x34a   :  { %v2053_v18 = vadd.f32 %v2044_v40, %v1997_v22  ;;  %v1991_v4 = vpop.f32.mrb[23].mxu1  ;;  %v2000_v47 = vadd.f32 %v2686_v37, %v1940_v20 }
 0x34b   :  { %v2051_v48 = vadd.f32 %v2040_v16, %v1989_v53  ;;  %v1992_v61 = vadd.f32 %v1991_v4, %v3919_v57  ;;  %v2035_v57 = vadd.f32 %v3929_v39, %v1989_v53  ;;  %v1058_v53 = vmul.f32 %v3917_v3, %v4022_v12  ;;  %v2455_v3 = vld [vmem:[%s4163_s7 + $0x2] sm:$0x3] }
 0x34c   :  { %2063 = vrot.lane.b32.xlu0 %v2053_v18, %s3049_s3  ;;  %v2054_v56 = vadd.f32 %v2046_v62, %v2000_v47  ;;  %v3038_v62 = vld [vmem:[%s4157_s4 + $0x18] sm:$0xff] }
 0x34d   :  { %2059 = vrot.lane.b32.xlu1 %v2051_v48, %s3049_s3  ;;  %v2052_v44 = vadd.f32 %v2042_v38, %v1992_v61 }
 0x350   :  { %2099 = vperm.xlu0 %2710, %v3686_v49  }
 0x351   :  { %2065 = vrot.lane.b32.xlu1 %v2054_v56, %s3049_s3  ;;  %v2458_v56 = vld.sshfl [vmem:[%s4161_s6 + $0x2] sm:$0x11 pattern:$0x75316420] }
 0x354   :  { %2061 = vrot.lane.b32.xlu0 %v2052_v44, %s3049_s3 }
 0x355   :  { %2148 = vperm.xlu1 %2716, %v3667_v33   ;;  %2717 = vset.pattern.permute.xlu0 %v3048_v19 }
 0x358   :  { %1189 = vperm.xlu0 %2717, %v3632_v2  }
 0x359   :  { %2152 = vperm.xlu1 %2716, %v3646_v6   ;;  %v3036_v6 = vld [vmem:[%s4157_s4] sm:$0xff] }
 0x35c   :  { %2160 = vperm.xlu0 %2717, %v3703_v54  }
 0x35d   :  { %2156 = vperm.xlu1 %2716, %v3686_v49   ;;  %v2037_v49 = vadd.f32 %v3933_v23, %v1997_v22  ;;  %v3039_v23 = vld [vmem:[%s4157_s4 + $0x90] sm:$0xff]  ;;  %v4029_v22 = vsub.s32 0, %v1117_v29 }
 0x360   :  { %2721 = vset.pattern.permute.xlu0 %v3050_v15 }
 0x361   :  { %1283 = vperm.xlu0 %2721, %v3632_v2   ;;  %2718 = vset.pattern.permute.xlu1 %v3045_v50  ;;  %v2038_v2 = vadd.f32 %v3941_v59, %v2000_v47  ;;  %v1072_v50 = vadd.f32 %v3921_v24, %v1030_v31  ;;  %v2375_v31 = vld.sshfl [vmem:[%s4161_s6] sm:$0x11 pattern:$0x75316420]  ;;  %s2688_s6 = spop %2687 }
 0x362   :  { %2103 = vperm.xlu1 %2718, %v3703_v54   ;;  %v3979_v54 = vpop.permute.xlu0 %2095  ;;  %v1112_v60 = vcombine.high %v2375_v31, %v2375_v31  ;;  %v1119_v30 = vrot.slane %v2375_v31, %v4015_v21  ;;  %s2690_s7 = spop %2689 }
 0x364   :  { %v1126_v55 = vrot.slane %v1112_v60, %v4015_v21  ;;  %v1146_v48 = vrot.slane %v1119_v30, %v4029_v22 }
 0x365   :  { %2242 = vperm.xlu0 %2721, %v3667_v33   ;;  %v1075_v33 = vadd.f32 %v3927_v7, %v1041_v52 }
 0x366   :  { %2719 = vset.pattern.permute.xlu1 %v3041_v1  ;;  %v1150_v47 = vrot.slane %v1126_v55, %v4029_v22 }
 0x367   :  { %2191 = vperm.xlu1 %2719, %v2035_v57  }
 0x369   :  { %1287 = vperm.xlu0 %2721, %v3640_v43   ;;  %v3037_v43 = vld [vmem:[%s4157_s4 + $0x88] sm:$0xff] }
 0x36b   :  { %2720 = vset.pattern.permute.xlu1 %v3050_v15 }
 0x36c   :  { %1279 = vperm.xlu1 %2720, %v3036_v6  }
 0x36d   :  { %2724 = vset.pattern.permute.xlu0 %v3041_v1 }
 0x36e   :  { %1050 = vperm.xlu0 %2724, %v3661_v25   ;;  %v2036_v25 = vadd.f32 %v3939_v41, %v1992_v61  ;;  %v3040_v41 = vld [vmem:[%s4157_s4 + $0x98] sm:$0xff] }
 0x370   :  { %2722 = vset.pattern.permute.xlu1 %v3041_v1 }
 0x371   :  { %2206 = vperm.xlu1 %2722, %v2038_v2   ;;  %v1154_v2 = vmul.f32 %v1146_v48, %v3931_v10 }
 0x372   :  { %1228 = vperm.xlu0 %2724, %v1072_v50   ;;  %v1158_v50 = vmul.f32 %v1150_v47, %v3931_v10  ;;  %v1156_v10 = vmul.f32 %v1146_v48, %v3925_v58 }
 0x375   :  { %2723 = vset.pattern.permute.xlu1 %v3050_v15 }
 0x376   :  { %2013 = vperm.xlu0 %2724, %v3884_v17   ;;  %2246 = vperm.xlu1 %2723, %v3037_v43   ;;  %v3981_v17 = vpop.permute.xlu1 %2018  ;;  %v1159_v43 = vmul.f32 %v1150_v47, %v3935_v45 }
 0x37a   :  { %1243 = vperm.xlu0 %2724, %v1075_v33   ;;  %2725 = vset.pattern.permute.xlu1 %v3041_v1  ;;  %v3983_v16 = vpop.permute.xlu1 %2091  ;;  %v2075_v33 = vcombine.high %v2458_v56, %v2458_v56 }
 0x37b   :  { %2196 = vperm.xlu1 %2725, %v2036_v25  }
 0x37c   :  { %v2089_v14 = vrot.slane %v2075_v33, %v4015_v21 }
 0x37e   :  { %2201 = vperm.xlu0 %2724, %v2037_v49  }
 0x39c   :  { %v1101_v19 = vpop.permute.xlu0 %1100 }
 0x39d   :  { %1255 = vperm.xlu1 %2725, %v1101_v19  }
 0x3a0   :  { %v1097_v28 = vpop.permute.xlu0 %1096 }
 0x3a1   :  { %1247 = vperm.xlu0 %2724, %v1097_v28  }
 0x3a9   :  { %v3985_v20 = vpop.permute.xlu1 %1238 }
 0x3ad   :  { %v1103_v32 = vpop.permute.xlu1 %1102 }
 0x3ae   :  { %1259 = vperm.xlu0 %2724, %v1103_v32  }
 0x3b1   :  { %v1099_v38 = vpop.permute.xlu1 %1098 }
 0x3b2   :  { %1251 = vperm.xlu1 %2725, %v1099_v38  }
 0x3b5   :  { %v3987_v1 = vpop.permute.xlu1 %1233 }
 0x3be   :  { %v2064_v24 = vpop.permute.xlu0 %2063 }
 0x3bf   :  { %v2060_v40 = vpop.permute.xlu1 %2059  ;;  %2218 = vperm.xlu1 %2725, %v2064_v24   ;;  %v1153_v24 = vmul.f32 %v1146_v48, %v3923_v0 }
 0x3c0   :  { %2210 = vperm.xlu0 %2724, %v2060_v40   ;;  %v1157_v40 = vmul.f32 %v1150_v47, %v3923_v0 }
 0x3c3   :  { %v2066_v46 = vpop.permute.xlu1 %2065 }
 0x3c4   :  { %2727 = vset.pattern.permute.xlu0 %v3050_v15  ;;  %2222 = vperm.xlu1 %2725, %v2066_v46   ;;  %v1160_v46 = vmul.f32 %v1150_v47, %v3925_v58  ;;  %v1155_v47 = vmul.f32 %v1146_v48, %v3935_v45 }
 0x3c5   :  { %1291 = vperm.xlu0 %2727, %v3038_v62  }
 0x3cf   :  { %v3992_v5 = vpop.permute.xlu0 %2099 }
 0x3d3   :  { %v2062_v7 = vpop.permute.xlu0 %2061 }
 0x3d4   :  { %2214 = vperm.xlu1 %2725, %v2062_v7   ;;  %v4006_v63 = vpop.permute.xlu1 %2148 }
 0x3d7   :  { %v3994_v39 = vpop.permute.xlu0 %1189 }
 0x3d8   :  { %2726 = vset.pattern.permute.xlu1 %v3050_v15  ;;  %v4017_v34 = vpop.permute.xlu1 %2152  ;;  %v4044_v15 = vld [vmem:[%s4162_s8 + $0x2] sm:$0x3] }
 0x3d9   :  { %2250 = vperm.xlu1 %2726, %v3039_v23   ;;  %v2021_v19 = vmul.f32 %v4044_v15, %v3981_v17 }
 0x3db   :  { %v3999_v36 = vpop.permute.xlu0 %2160 }
 0x3dc   :  { %v4033_v18 = vpop.permute.xlu1 %2156 }
 0x3dd   :  { %2254 = vperm.xlu1 %2726, %v3040_v41   ;;  %v2082_v41 = vrot.slane %v2458_v56, %v4015_v21 }
 0x3e0   :  { %v4004_v59 = vpop.permute.xlu0 %1283 }
 0x3e1   :  { %v4053_v25 = vpop.permute.xlu1 %2103 }
 0x3e4   :  { %v4008_v11 = vpop.permute.xlu0 %2242 }
 0x3e6   :  { %v4072_v31 = vpop.permute.xlu1 %2191 }
 0x3e8   :  { %v4013_v52 = vpop.permute.xlu0 %1287 }
 0x3ed   :  { %v1051_v42 = vpop.permute.xlu0 %1050 }
 0x3ee   :  { %v1053_v37 = vmul.f32 %v1051_v42, %v1045_v35 }
 0x3f0   :  { %v1059_v4 = vadd.f32 %v1058_v53, %v1053_v37 }
 0x3f1   :  { %v1229_v61 = vpop.permute.xlu0 %1228 }
 0x3f2   :  { %v1168_v44 = vrot.slane %v1059_v4, %v4015_v21 }
 0x3f4   :  { %v1169_v57 = vcombine.high %v1168_v44, %v1168_v44  ;;  %v1176_v6 = vrot.slane %v1168_v44, %v4015_v21 }
 0x3f5   :  { %v2014_v49 = vpop.permute.xlu0 %2013 }
 0x3f6   :  { %v1183_v28 = vrot.slane %v1169_v57, %v4015_v21  ;;  %v1203_v32 = vrot.slane %v1176_v6, %v4029_v22  ;;  %v2016_v38 = vmul.f32 %v2455_v3, %v2014_v49 }
 0x3f8   :  { %v1207_v62 = vrot.slane %v1183_v28, %v4029_v22  ;;  %v1210_v7 = vmul.f32 %v1203_v32, %v3937_v8  ;;  %v1211_v23 = vmul.f32 %v1203_v32, %v3994_v39  ;;  %v2022_v17 = vadd.f32 %v2021_v19, %v2016_v38 }
 0x3f9   :  { %v1213_v13 = vmul.f32 %v1203_v32, %v3945_v9  ;;  %v1212_v26 = vmul.f32 %v1203_v32, %v3943_v51 }
 0x3fa   :  { %v1218_v0 = vadd.f32 %v1210_v7, %v1153_v24  ;;  %v1219_v27 = vadd.f32 %v1211_v23, %v1154_v2  ;;  %v2131_v29 = vrot.slane %v2022_v17, %v4015_v21  ;;  %v1216_v58 = vmul.f32 %v1207_v62, %v3943_v51 }
 0x3fb   :  { %v1221_v60 = vadd.f32 %v1213_v13, %v1156_v10  ;;  %v1214_v35 = vmul.f32 %v1207_v62, %v3937_v8  ;;  %v1217_v30 = vmul.f32 %v1207_v62, %v3945_v9  ;;  %v1215_v55 = vmul.f32 %v1207_v62, %v3994_v39 }
 0x3fc   :  { %v1263_v42 = vadd.f32 %v3987_v1, %v1219_v27  ;;  %v1262_v53 = vadd.f32 %v1229_v61, %v1218_v0  ;;  %v2132_v37 = vcombine.high %v2131_v29, %v2131_v29  ;;  %v2139_v4 = vrot.slane %v2131_v29, %v4015_v21  ;;  %v1280_v1 = vpop.permute.xlu1 %1279 }
 0x3fd   :  { %v1224_v56 = vadd.f32 %v1216_v58, %v1159_v43  ;;  %v1222_v44 = vadd.f32 %v1214_v35, %v1157_v40  ;;  %v1225_v51 = vadd.f32 %v1217_v30, %v1160_v46  ;;  %v4085_v9 = vrot.slane %v2082_v41, %v4029_v22  ;;  %v1244_v46 = vpop.permute.xlu0 %1243 }
 0x3fe   :  { %v1271_v3 = vmax.f32 %v1263_v42, 0.0  ;;  %v1270_v57 = vmax.f32 %v1262_v53, 0.0  ;;  %v2146_v6 = vrot.slane %v2132_v37, %v4015_v21  ;;  %v4082_v8 = vrot.slane %v2139_v4, %v4029_v22 }
 0x3ff   :  { %v1223_v39 = vadd.f32 %v1215_v55, %v1158_v50  ;;  %v1220_v61 = vadd.f32 %v1212_v26, %v1155_v47  ;;  %v4088_v2 = vrot.slane %v2089_v14, %v4029_v22  ;;  %v2118_v21 = vmul.f32 %v4085_v9, %v3992_v5 }
 0x400   :  { %v1295_v45 = vmul.f32 %v4004_v59, %v1271_v3  ;;  %v1294_v48 = vmul.f32 %v1280_v1, %v1270_v57  ;;  %v4092_v43 = vrot.slane %v2146_v6, %v4029_v22  ;;  %v2175_v33 = vmul.f32 %v4082_v8, %v4033_v18  ;;  %v4108_v10 = vpop.permute.xlu1 %2206 }
 0x401   :  { %v1264_v49 = vadd.f32 %v3985_v20, %v1220_v61  ;;  %v2122_v50 = vmul.f32 %v4088_v2, %v3992_v5  ;;  %v2202_v20 = vpop.permute.xlu0 %2201  ;;  %v1265_v42 = vadd.f32 %v1244_v46, %v1221_v60  ;;  %v2174_v3 = vmul.f32 %v4082_v8, %v4017_v34 }
 0x402   :  { %v1302_v19 = vadd.f32 %v1295_v45, %v1294_v48  ;;  %v2179_v28 = vmul.f32 %v4092_v43, %v4033_v18  ;;  %v4103_v32 = vadd.f32 %v2175_v33, %v2118_v21  ;;  %v2177_v21 = vmul.f32 %v4092_v43, %v4006_v63 }
 0x403   :  { %v1272_v38 = vmax.f32 %v1264_v49, 0.0  ;;  %v1273_v4 = vmax.f32 %v1265_v42, 0.0  ;;  %v2178_v46 = vmul.f32 %v4092_v43, %v4017_v34 }
 0x404   :  { %v4105_v22 = vadd.f32 %v2179_v28, %v2122_v50  ;;  %v4110_v62 = vpop.permute.xlu1 %2246  ;;  %v2120_v50 = vmul.f32 %v4088_v2, %v3983_v16 }
 0x405   :  { %v1296_v24 = vmul.f32 %v4013_v52, %v1272_v38 }
 0x407   :  { %v1303_v40 = vadd.f32 %v1302_v19, %v1296_v24 }
 0x408   :  { %v2197_v7 = vpop.permute.xlu1 %2196 }
 0x41c   :  { %v1256_v23 = vpop.permute.xlu1 %1255 }
 0x41d   :  { %v1268_v41 = vadd.f32 %v1256_v23, %v1224_v56  ;;  %v2173_v56 = vmul.f32 %v4082_v8, %v4006_v63 }
 0x41f   :  { %v1276_v26 = vmax.f32 %v1268_v41, 0.0  ;;  %v2176_v41 = vmul.f32 %v4082_v8, %v3999_v36 }
 0x420   :  { %v1248_v5 = vpop.permute.xlu0 %1247 }
 0x421   :  { %v1266_v17 = vadd.f32 %v1248_v5, %v1222_v44  ;;  %v1300_v58 = vmul.f32 %v4013_v52, %v1276_v26  ;;  %v2116_v52 = vmul.f32 %v4085_v9, %v3983_v16  ;;  %v2119_v5 = vmul.f32 %v4085_v9, %v4053_v25 }
 0x422   :  { %v2121_v16 = vmul.f32 %v4088_v2, %v3979_v54  ;;  %v1323_v26 = vstv %s2688_s6 }
 0x423   :  { %v1274_v14 = vmax.f32 %v1266_v17, 0.0 }
 0x425   :  { %v1298_v27 = vmul.f32 %v1280_v1, %v1274_v14  ;;  %v2181_v1 = vadd.f32 %v2173_v56, %v2116_v52 }
 0x427   :  { %v2225_v19 = vadd.f32 %v4072_v31, %v2181_v1  ;;  %v2123_v31 = vmul.f32 %v4088_v2, %v4053_v25 }
 0x429   :  { %v2233_v34 = vmax.f32 %v2225_v19, 0.0 }
 0x42d   :  { %v1260_v30 = vpop.permute.xlu0 %1259 }
 0x42e   :  { %v1269_v53 = vadd.f32 %v1260_v30, %v1225_v51 }
 0x430   :  { %v1277_v47 = vmax.f32 %v1269_v53, 0.0 }
 0x431   :  { %v1252_v18 = vpop.permute.xlu1 %1251 }
 0x432   :  { %v1267_v13 = vadd.f32 %v1252_v18, %v1223_v39  ;;  %v2180_v18 = vmul.f32 %v4092_v43, %v3999_v36  ;;  %v2257_v36 = vmul.f32 %v4008_v11, %v2233_v34 }
 0x434   :  { %v1275_v0 = vmax.f32 %v1267_v13, 0.0  ;;  %v2188_v2 = vadd.f32 %v2180_v18, %v2123_v31 }
 0x436   :  { %v1299_v29 = vmul.f32 %v4004_v59, %v1275_v0  ;;  %v2117_v59 = vmul.f32 %v4085_v9, %v3979_v54  ;;  %v2227_v0 = vadd.f32 %v2202_v20, %v4103_v32 }
 0x438   :  { %v1311_v35 = vadd.f32 %v1299_v29, %v1298_v27  ;;  %v2182_v39 = vadd.f32 %v2174_v3, %v2117_v59  ;;  %v2186_v27 = vadd.f32 %v2178_v46, %v2121_v16  ;;  %v2235_v53 = vmax.f32 %v2227_v0, 0.0 }
 0x43a   :  { %v1312_v55 = vadd.f32 %v1311_v35, %v1300_v58  ;;  %v2226_v28 = vadd.f32 %v2197_v7, %v2182_v39  ;;  %v2184_v35 = vadd.f32 %v2176_v41, %v2119_v5  ;;  %v2286_v41 = vstv %s2690_s7 }
 0x43c   :  { %v2234_v14 = vmax.f32 %v2226_v28, 0.0 }
 0x43e   :  { %v2219_v61 = vpop.permute.xlu1 %2218  ;;  %v2258_v43 = vmul.f32 %v4110_v62, %v2234_v14 }
 0x43f   :  { %v2211_v37 = vpop.permute.xlu0 %2210  ;;  %v2231_v8 = vadd.f32 %v2219_v61, %v4105_v22 }
 0x440   :  { %v2265_v3 = vadd.f32 %v2258_v43, %v2257_v36 }
 0x441   :  { %v2239_v32 = vmax.f32 %v2231_v8, 0.0 }
 0x443   :  { %v2223_v23 = vpop.permute.xlu1 %2222 }
 0x444   :  { %v1292_v44 = vpop.permute.xlu0 %1291  ;;  %v2232_v20 = vadd.f32 %v2223_v23, %v2188_v2 }
 0x445   :  { %v1297_v57 = vmul.f32 %v1292_v44, %v1273_v4  ;;  %v1301_v6 = vmul.f32 %v1292_v44, %v1277_v47  ;;  %v2228_v4 = vadd.f32 %v4108_v10, %v2184_v35 }
 0x446   :  { %v2240_v52 = vmax.f32 %v2232_v20, 0.0 }
 0x447   :  { %v1304_v60 = vadd.f32 %v1303_v40, %v1297_v57  ;;  %v1313_v51 = vadd.f32 %v1312_v55, %v1301_v6  ;;  %v2185_v40 = vadd.f32 %v2177_v21, %v2120_v50 }
 0x449   :  { %v1305_v45 = vrot.slane %v1304_v60, 4  ;;  %v1314_v48 = vrot.slane %v1313_v51, 4  ;;  %v2229_v7 = vadd.f32 %v2211_v37, %v2185_v40 }
 0x44b   :  { %v1306_v33 = vadd.f32 %v1305_v45, %v1304_v60  ;;  %v1315_v49 = vadd.f32 %v1314_v48, %v1313_v51  ;;  %v2237_v25 = vmax.f32 %v2229_v7, 0.0  ;;  %v2236_v51 = vmax.f32 %v2228_v4, 0.0 }
 0x44d   :  { %v1307_v38 = vrot.slane %v1306_v33, 2  ;;  %v1316_v24 = vrot.slane %v1315_v49, 2  ;;  %v2261_v47 = vmul.f32 %v4008_v11, %v2237_v25 }
 0x44f   :  { %v1308_v17 = vadd.f32 %v1307_v38, %v1306_v33  ;;  %v1317_v63 = vadd.f32 %v1316_v24, %v1315_v49 }
 0x451   :  { %v1309_v9 = vrot.slane %v1308_v17, 1  ;;  %v1318_v13 = vrot.slane %v1317_v63, 1 }
 0x453   :  { %v1310_v29 = vadd.f32 %v1309_v9, %v1308_v17  ;;  %v1319_v54 = vadd.f32 %v1318_v13, %v1317_v63  ;;  %v2215_v58 = vpop.permute.xlu1 %2214 }
 0x454   :  { %v2230_v30 = vadd.f32 %v2215_v58, %v2186_v27 }
 0x455   :  { %v1325_v55 = vadd.f32 %v1323_v26, %v1310_v29  ;;  %v1326_v42 = vadd.f32 %v1323_v26, %v1319_v54 }
 0x456   :  { %v2238_v37 = vmax.f32 %v2230_v30, 0.0 }
 0x457   :  { %v1330_v22 = vsel %vm1329_vm0, %v1326_v42, %v1325_v55 }
 0x458   :  { %v2262_v44 = vmul.f32 %v4110_v62, %v2238_v37  ;;  %v2251_v56 = vpop.permute.xlu1 %2250  ;;  %v1332_v10 = vsub.f32 %v4022_v12, %v1330_v22 }
 0x459   :  { %v2259_v57 = vmul.f32 %v2251_v56, %v2235_v53  ;;  %v2263_v6 = vmul.f32 %v2251_v56, %v2239_v32 }
 0x45a   :  { %v2274_v59 = vadd.f32 %v2262_v44, %v2261_v47  ;;  %v1333_v50 = vmul.f32 %v1332_v10, %v1332_v10 }
 0x45b   :  { %v2266_v60 = vadd.f32 %v2265_v3, %v2259_v57 }
 0x45c   :  { %v2275_v1 = vadd.f32 %v2274_v59, %v2263_v6  ;;  %v2255_v39 = vpop.permute.xlu1 %2254  ;;  %v1335_v40 = vsel %vm1334_vm1, %v1333_v50, 0.0 }
 0x45d   :  { %v2260_v61 = vmul.f32 %v2255_v39, %v2236_v51  ;;  %v2264_v45 = vmul.f32 %v2255_v39, %v2240_v52  ;;  %v1336_v23 = vrot.slane %v1335_v40, 4 }
 0x45f   :  { %v2267_v48 = vadd.f32 %v2266_v60, %v2260_v61  ;;  %v2276_v21 = vadd.f32 %v2275_v1, %v2264_v45  ;;  %v1337_v31 = vadd.f32 %v1336_v23, %v1335_v40 }
 0x461   :  { %v2268_v33 = vrot.slane %v2267_v48, 4  ;;  %v2277_v11 = vrot.slane %v2276_v21, 4  ;;  %v1338_v14 = vrot.slane %v1337_v31, 2 }
 0x463   :  { %v2269_v49 = vadd.f32 %v2268_v33, %v2267_v48  ;;  %v2278_v62 = vadd.f32 %v2277_v11, %v2276_v21  ;;  %v1339_v26 = vadd.f32 %v1338_v14, %v1337_v31 }
 0x465   :  { %v2270_v19 = vrot.slane %v2269_v49, 2  ;;  %v2279_v28 = vrot.slane %v2278_v62, 2  ;;  %v1340_v8 = vrot.slane %v1339_v26, 1 }
 0x467   :  { %v2271_v38 = vadd.f32 %v2270_v19, %v2269_v49  ;;  %v2280_v24 = vadd.f32 %v2279_v28, %v2278_v62  ;;  %v1341_v58 = vadd.f32 %v1340_v8, %v1339_v26 }
 0x469   :  { %v2272_v46 = vrot.slane %v2271_v38, 1  ;;  %v2281_v5 = vrot.slane %v2280_v24, 1 }
 0x46b   :  { %v2273_v17 = vadd.f32 %v2272_v46, %v2271_v38  ;;  %v2282_v63 = vadd.f32 %v2281_v5, %v2280_v24 }
 0x46d   :  { %v2288_v12 = vadd.f32 %v2286_v41, %v2273_v17  ;;  %v2289_v16 = vadd.f32 %v2286_v41, %v2282_v63 }
 0x46f   :  { %v2292_v7 = vsel %vm1329_vm0, %v2289_v16, %v2288_v12 }
 0x470   :  { %v2294_v18 = vsub.f32 %v4044_v15, %v2292_v7 }
 0x472   :  { %v2295_v34 = vmul.f32 %v2294_v18, %v2294_v18 }
 0x474   :  { %v2296_v9 = vsel %vm1334_vm1, %v2295_v34, 0.0 }
 0x475   :  { %v2297_v13 = vrot.slane %v2296_v9, 4 }
 0x477   :  { %v2298_v0 = vadd.f32 %v2297_v13, %v2296_v9 }
 0x479   :  { %v2299_v27 = vrot.slane %v2298_v0, 2 }
 0x47b   :  { %v2300_v29 = vadd.f32 %v2299_v27, %v2298_v0 }
 0x47d   :  { %v2301_v54 = vrot.slane %v2300_v29, 1 }
 0x47f   :  { %v2302_v35 = vadd.f32 %v2301_v54, %v2300_v29 }
 0x481   :  { %v2303_v25 = vadd.f32 %v2302_v35, %v1341_v58 }
 0x483   :  { %2304 = vst [vmem:[%s4164_s9] sm:$0x1] %v2303_v25 }

</bundles_post_ra>
